<compile_context>
chip_gen: v5e
topology: v5e:2x2
jax: 0.10.0
libtpu: 0.0.40
codegen_flags: <defaults>
</compile_context>

<pallas_src>
import functools
import math

import jax
import jax.numpy as jnp
from jax.experimental import pallas as pl
from jax.experimental.pallas import tpu as pltpu

NUM_HEADS = 8


def _pick_batch_tile(b, target):
    """Largest divisor of `b` that is <= target and a multiple of 8 sublanes
    (keeps the batch-tiled output block layout-legal), preferring >= 2 grid
    steps so v7x can split the 'parallel' axis across its two TensorCores.
    Falls back to the whole batch (grid of 1) when b is small."""
    hi = min(target, max(b // 2, 1))
    for t in range(hi, 0, -1):
        if b % t == 0 and t % 8 == 0:
            return t
    return b


def _conv3_flat(x, w_ref, b, frames):
    """Conv1d(kernel=3, padding=1) over the frame axis on a channels-last
    (tile_b*frames, Cin) operand.  Three lane-dense MXU matmuls over the full
    flattened row dim; the +/-1 frame shifts are applied to the f32 tap
    outputs with pltpu.roll + a frame-boundary mask (zero padding folded in,
    no VMEM scratch, no sliced read-modify-write)."""
    m = x.shape[0]
    y_c = jnp.dot(x, w_ref[1], preferred_element_type=jnp.float32)
    y_p = jnp.dot(x, w_ref[0], preferred_element_type=jnp.float32)
    y_n = jnp.dot(x, w_ref[2], preferred_element_type=jnp.float32)
    t = jax.lax.broadcasted_iota(jnp.int32, (m, 1), 0) % frames
    # tap 0 contributes x[i-1] @ W0 == roll(y_p, +1)[i]; zero at frame 0
    prev = jnp.where(t == 0, 0.0, pltpu.roll(y_p, shift=1, axis=0))
    # tap 2 contributes x[i+1] @ W2 == roll(y_n, -1)[i]; zero at frame F-1
    nxt = jnp.where(t == frames - 1, 0.0, pltpu.roll(y_n, shift=m - 1, axis=0))
    return y_c + prev + nxt + b


# ---------------------------------------------------------------------------
# Single fused kernel: patch-embed stand-in -> conv1 -> conv2 -> QKV ->
# multi-head attention -> frame mean -> out_proj -> fc, per batch tile.
# TODO(synk): the pretrained timm swin_tiny_patch4_window7_224 backbone
#             (window attention, shifted windows, patch merging) has no compact
#             Pallas equivalent; a deterministic patch-embed linear stand-in
#             produces the same (N, 768) shape as forward_features(x).mean([1,2]).
# ---------------------------------------------------------------------------
def _fused_forward_kernel(x_ref, wpe_ref, bpe_ref, wc1_ref, bc1_ref,
                          wc2_ref, bc2_ref, wqkv_ref, bqkv_ref,
                          wout_ref, bout_ref, wfc_ref, bfc_ref, o_ref,
                          *, frames, heads):
    tb = x_ref.shape[0]
    m = tb * frames

    # Patch-embed stand-in on spatially pooled pixels (mean hoisted to wrapper).
    xf = x_ref[...].reshape(m, x_ref.shape[2])
    feat = jnp.dot(xf, wpe_ref[...], preferred_element_type=jnp.float32) + bpe_ref[...]
    feat = feat.astype(jnp.bfloat16)                                     # (m, 768)

    # conv1 + ReLU, conv2 + ReLU (frames flattened into the MXU row dim).
    h1 = jnp.maximum(_conv3_flat(feat, wc1_ref, bc1_ref[...], frames), 0.0)
    h1 = h1.astype(jnp.bfloat16)                                         # (m, 128)
    h2 = jnp.maximum(_conv3_flat(h1, wc2_ref, bc2_ref[...], frames), 0.0)
    h2 = h2.astype(jnp.bfloat16)                                         # (m, 64)

    # Fused MHA in-projection: one lane-dense (64, 192) matmul; never hits HBM.
    qkv = jnp.dot(h2, wqkv_ref[...], preferred_element_type=jnp.float32) + bqkv_ref[...]
    e = wout_ref.shape[0]
    hd = e // heads
    scale = 1.0 / math.sqrt(hd)
    q = qkv[:, :e].reshape(tb, frames, e).astype(jnp.bfloat16)
    k = qkv[:, e:2 * e].reshape(tb, frames, e).astype(jnp.bfloat16)
    v = qkv[:, 2 * e:].reshape(tb, frames, e).astype(jnp.bfloat16)

    # Per-head attention entirely in vregs (F = hd = 8), pooled over frames.
    # The frame mean commutes with the affine out-projection, so pooling first.
    pooled_heads = []
    for h in range(heads):
        sl = slice(h * hd, (h + 1) * hd)
        s = jnp.einsum('bqd,bkd->bqk', q[:, :, sl], k[:, :, sl],
                       preferred_element_type=jnp.float32) * scale
        s_max = jnp.max(s, axis=-1, keepdims=True)
        p = jnp.exp(s - s_max)
        p = p * pl.reciprocal(jnp.sum(p, axis=-1, keepdims=True), approx=True)
        ctx = jnp.einsum('bqk,bkd->bqd', p.astype(jnp.bfloat16), v[:, :, sl],
                         preferred_element_type=jnp.float32)             # (tb, F, hd)
        pooled_heads.append(jnp.mean(ctx, axis=1))                       # (tb, hd)
    pooled = jnp.concatenate(pooled_heads, axis=-1)                      # (tb, 64) f32

    # Attention out-projection + final Linear (bf16 operands, f32 accumulate).
    a = jnp.dot(pooled.astype(jnp.bfloat16), wout_ref[...],
                preferred_element_type=jnp.float32) + bout_ref[...]
    out = jnp.dot(a.astype(jnp.bfloat16), wfc_ref[...],
                  preferred_element_type=jnp.float32) + bfc_ref[...]
    o_ref[...] = out.astype(o_ref.dtype)


# ---------------------------------------------------------------------------
# Wrapper: spatial-mean hoist + one pallas_call gridded over batch tiles.
# ---------------------------------------------------------------------------
def cnn_attention_model_swin2(x, params, *, tile_b=32):
    B, F, C, H, W = x.shape
    ph = pw = 4
    N = B * F
    # Spatial mean over the 4x4 patch grid commutes with the linear patch-embed
    # stand-in, so only (B, F, C*16) ever reaches the kernel.
    pooled = x.reshape(N, C, H // ph, ph, W // pw, pw).mean(axis=(2, 4))
    pooled = pooled.reshape(B, F, C * ph * pw).astype(jnp.bfloat16)

    tb = _pick_batch_tile(B, tile_b)
    out_size = params['w_fc'].shape[1]

    def full_spec(a):
        nd = a.ndim
        return pl.BlockSpec(a.shape, lambda i: (0,) * nd)

    weights = [params[k] for k in ('w_pe', 'b_pe', 'w_conv1', 'b_conv1',
                                   'w_conv2', 'b_conv2', 'w_qkv', 'b_qkv',
                                   'w_out', 'b_out', 'w_fc', 'b_fc')]

    return pl.pallas_call(
        functools.partial(_fused_forward_kernel, frames=F, heads=NUM_HEADS),
        out_shape=jax.ShapeDtypeStruct((B, out_size), jnp.float32),
        grid=(B // tb,),
        in_specs=[pl.BlockSpec((tb, F, C * ph * pw), lambda i: (i, 0, 0))]
                + [full_spec(w) for w in weights],
        out_specs=pl.BlockSpec((tb, out_size), lambda i: (i, 0)),
        compiler_params=pltpu.CompilerParams(dimension_semantics=("parallel",)),
    )(pooled, *weights)


def init_params(key, in_channels=3, d_swin=768, embed=64, output_size=8):
    ks = jax.random.split(key, 12)
    kin = in_channels * 4 * 4
    n = lambda k, shape, fan: jax.random.normal(k, shape, jnp.float32) / math.sqrt(fan)
    return {
        # patch-embed stand-in, (in, out) layout, bf16 MXU operands
        'w_pe':    n(ks[0], (kin, d_swin), kin).astype(jnp.bfloat16),
        'b_pe':    n(ks[1], (1, d_swin), d_swin),
        # conv weights (tap, Cin, Cout): w[j, c, o] == torch_conv.weight[o, c, j]
        'w_conv1': n(ks[2], (3, d_swin, 128), 3 * d_swin).astype(jnp.bfloat16),
        'b_conv1': n(ks[3], (1, 128), 128),
        'w_conv2': n(ks[4], (3, 128, embed), 3 * 128).astype(jnp.bfloat16),
        'b_conv2': n(ks[5], (1, embed), embed),
        # fused MHA in-projection (== torch in_proj_weight.T), head-major blocks
        'w_qkv':   n(ks[6], (embed, 3 * embed), embed).astype(jnp.bfloat16),
        'b_qkv':   n(ks[7], (1, 3 * embed), embed),
        # out-projection / final fc stored transposed (in, out), bf16 operands
        'w_out':   n(ks[8], (embed, embed), embed).astype(jnp.bfloat16),
        'b_out':   n(ks[9], (1, embed), embed),
        'w_fc':    n(ks[10], (embed, output_size), embed).astype(jnp.bfloat16),
        'b_fc':    n(ks[11], (1, output_size), output_size),
    }


if __name__ == "__main__":
    key = jax.random.PRNGKey(0)
    k_x, k_p = jax.random.split(key)

    B, F, C, H, W = 2, 8, 3, 16, 16        # (batch, num_frames, channels, height, width)
    output_size = 8
    x = jax.random.normal(k_x, (B, F, C, H, W), jnp.float32)
    params = init_params(k_p, in_channels=C, output_size=output_size)

    fwd = jax.jit(cnn_attention_model_swin2)
    out = jax.block_until_ready(fwd(x, params))
    assert out.shape == (B, output_size), out.shape
    assert jnp.all(jnp.isfinite(out))
    print("KERNEL_OK")
</pallas_src>

<mosaic_0001>
module attributes {stable_mosaic.version = 11 : i64} {
  func.func @_fused_forward_kernel(%arg0: i32, %arg1: memref<2x8x48xbf16, #tpu.memory_space<vmem>>, %arg2: memref<48x768xbf16, #tpu.memory_space<vmem>>, %arg3: memref<1x768xf32, #tpu.memory_space<vmem>>, %arg4: memref<3x768x128xbf16, #tpu.memory_space<vmem>>, %arg5: memref<1x128xf32, #tpu.memory_space<vmem>>, %arg6: memref<3x128x64xbf16, #tpu.memory_space<vmem>>, %arg7: memref<1x64xf32, #tpu.memory_space<vmem>>, %arg8: memref<64x192xbf16, #tpu.memory_space<vmem>>, %arg9: memref<1x192xf32, #tpu.memory_space<vmem>>, %arg10: memref<64x64xbf16, #tpu.memory_space<vmem>>, %arg11: memref<1x64xf32, #tpu.memory_space<vmem>>, %arg12: memref<64x8xbf16, #tpu.memory_space<vmem>>, %arg13: memref<1x8xf32, #tpu.memory_space<vmem>>, %arg14: memref<2x8xf32, #tpu.memory_space<vmem>>) attributes {dimension_semantics = [#tpu.dimension_semantics<parallel>], iteration_bounds = array<i64: 1>, scalar_prefetch = 0 : i64, scratch_operands = 0 : i64, tpu.core_type = #tpu.core_type<tc>, window_params = [{transform_indices = @transform_0, window_bounds = array<i64: 2, 8, 48>}, {pipeline_mode = #tpu.pipeline_mode<synchronous>, transform_indices = @transform_1, window_bounds = array<i64: 48, 768>}, {pipeline_mode = #tpu.pipeline_mode<synchronous>, transform_indices = @transform_2, window_bounds = array<i64: 1, 768>}, {pipeline_mode = #tpu.pipeline_mode<synchronous>, transform_indices = @transform_3, window_bounds = array<i64: 3, 768, 128>}, {pipeline_mode = #tpu.pipeline_mode<synchronous>, transform_indices = @transform_4, window_bounds = array<i64: 1, 128>}, {pipeline_mode = #tpu.pipeline_mode<synchronous>, transform_indices = @transform_5, window_bounds = array<i64: 3, 128, 64>}, {pipeline_mode = #tpu.pipeline_mode<synchronous>, transform_indices = @transform_6, window_bounds = array<i64: 1, 64>}, {pipeline_mode = #tpu.pipeline_mode<synchronous>, transform_indices = @transform_7, window_bounds = array<i64: 64, 192>}, {pipeline_mode = #tpu.pipeline_mode<synchronous>, transform_indices = @transform_8, window_bounds = array<i64: 1, 192>}, {pipeline_mode = #tpu.pipeline_mode<synchronous>, transform_indices = @transform_9, window_bounds = array<i64: 64, 64>}, {pipeline_mode = #tpu.pipeline_mode<synchronous>, transform_indices = @transform_10, window_bounds = array<i64: 1, 64>}, {pipeline_mode = #tpu.pipeline_mode<synchronous>, transform_indices = @transform_11, window_bounds = array<i64: 64, 8>}, {pipeline_mode = #tpu.pipeline_mode<synchronous>, transform_indices = @transform_12, window_bounds = array<i64: 1, 8>}, {transform_indices = @transform_13, window_bounds = array<i64: 2, 8>}]} {
    %c0 = arith.constant 0 : index
    %c0_0 = arith.constant 0 : index
    %c0_1 = arith.constant 0 : index
    %0 = vector.load %arg1[%c0, %c0_0, %c0_1] : memref<2x8x48xbf16, #tpu.memory_space<vmem>>, vector<2x8x48xbf16>
    %1 = vector.shape_cast %0 : vector<2x8x48xbf16> to vector<16x48xbf16>
    %c0_2 = arith.constant 0 : index
    %c0_3 = arith.constant 0 : index
    %2 = vector.load %arg2[%c0_2, %c0_3] : memref<48x768xbf16, #tpu.memory_space<vmem>>, vector<48x768xbf16>
    %cst = arith.constant dense<0.000000e+00> : vector<16x768xf32>
    %3 = tpu.matmul %1, %2, %cst {dimension_numbers = #tpu.dot_dimension_numbers<[1], [0], [0], [1], [0, 0, 1, 1], [], []>} : vector<16x48xbf16>, vector<48x768xbf16>, vector<16x768xf32> -> vector<16x768xf32>
    %c0_4 = arith.constant 0 : index
    %c0_5 = arith.constant 0 : index
    %4 = vector.load %arg3[%c0_4, %c0_5] : memref<1x768xf32, #tpu.memory_space<vmem>>, vector<1x768xf32>
    %5 = vector.broadcast %4 : vector<1x768xf32> to vector<16x768xf32>
    %6 = arith.addf %3, %5 : vector<16x768xf32>
    %7 = arith.truncf %6 : vector<16x768xf32> to vector<16x768xbf16>
    %c0_6 = arith.constant 0 : index
    %c0_7 = arith.constant 0 : index
    %8 = vector.load %arg5[%c0_6, %c0_7] : memref<1x128xf32, #tpu.memory_space<vmem>>, vector<1x128xf32>
    %c1 = arith.constant 1 : index
    %c0_8 = arith.constant 0 : index
    %c0_9 = arith.constant 0 : index
    %9 = vector.load %arg4[%c1, %c0_8, %c0_9] : memref<3x768x128xbf16, #tpu.memory_space<vmem>>, vector<1x768x128xbf16>
    %10 = vector.shape_cast %9 : vector<1x768x128xbf16> to vector<768x128xbf16>
    %cst_10 = arith.constant dense<0.000000e+00> : vector<16x128xf32>
    %11 = tpu.matmul %7, %10, %cst_10 {dimension_numbers = #tpu.dot_dimension_numbers<[1], [0], [0], [1], [0, 0, 1, 1], [], []>} : vector<16x768xbf16>, vector<768x128xbf16>, vector<16x128xf32> -> vector<16x128xf32>
    %c0_11 = arith.constant 0 : index
    %c0_12 = arith.constant 0 : index
    %c0_13 = arith.constant 0 : index
    %12 = vector.load %arg4[%c0_11, %c0_12, %c0_13] : memref<3x768x128xbf16, #tpu.memory_space<vmem>>, vector<1x768x128xbf16>
    %13 = vector.shape_cast %12 : vector<1x768x128xbf16> to vector<768x128xbf16>
    %cst_14 = arith.constant dense<0.000000e+00> : vector<16x128xf32>
    %14 = tpu.matmul %7, %13, %cst_14 {dimension_numbers = #tpu.dot_dimension_numbers<[1], [0], [0], [1], [0, 0, 1, 1], [], []>} : vector<16x768xbf16>, vector<768x128xbf16>, vector<16x128xf32> -> vector<16x128xf32>
    %c2 = arith.constant 2 : index
    %c0_15 = arith.constant 0 : index
    %c0_16 = arith.constant 0 : index
    %15 = vector.load %arg4[%c2, %c0_15, %c0_16] : memref<3x768x128xbf16, #tpu.memory_space<vmem>>, vector<1x768x128xbf16>
    %16 = vector.shape_cast %15 : vector<1x768x128xbf16> to vector<768x128xbf16>
    %cst_17 = arith.constant dense<0.000000e+00> : vector<16x128xf32>
    %17 = tpu.matmul %7, %16, %cst_17 {dimension_numbers = #tpu.dot_dimension_numbers<[1], [0], [0], [1], [0, 0, 1, 1], [], []>} : vector<16x768xbf16>, vector<768x128xbf16>, vector<16x128xf32> -> vector<16x128xf32>
    %18 = tpu.iota {dimensions = array<i32: 0>} : vector<16x1xi32>
    %c8_i32 = arith.constant 8 : i32
    %c0_i32 = arith.constant 0 : i32
    %19 = arith.cmpi eq, %c8_i32, %c0_i32 : i32
    %c1_i32 = arith.constant 1 : i32
    %20 = arith.select %19, %c1_i32, %c8_i32 : i32
    %21 = vector.broadcast %20 : i32 to vector<16x1xi32>
    %22 = arith.remsi %18, %21 : vector<16x1xi32>
    %c0_i32_18 = arith.constant 0 : i32
    %23 = vector.broadcast %c0_i32_18 : i32 to vector<16x1xi32>
    %24 = arith.cmpi ne, %22, %23 : vector<16x1xi32>
    %c0_i32_19 = arith.constant 0 : i32
    %25 = vector.broadcast %c0_i32_19 : i32 to vector<16x1xi32>
    %26 = arith.cmpi slt, %22, %25 : vector<16x1xi32>
    %c0_i32_20 = arith.constant 0 : i32
    %27 = arith.cmpi slt, %20, %c0_i32_20 : i32
    %28 = vector.broadcast %27 : i1 to vector<16x1xi1>
    %29 = vector.broadcast %28 : vector<16x1xi1> to vector<16x1xi1>
    %30 = arith.xori %26, %29 : vector<16x1xi1>
    %31 = arith.andi %30, %24 : vector<16x1xi1>
    %32 = vector.broadcast %20 : i32 to vector<16x1xi32>
    %33 = arith.addi %22, %32 : vector<16x1xi32>
    %34 = arith.select %31, %33, %22 : vector<16x1xi1>, vector<16x1xi32>
    %c0_i32_21 = arith.constant 0 : i32
    %35 = vector.broadcast %c0_i32_21 : i32 to vector<16x1xi32>
    %36 = arith.cmpi eq, %34, %35 : vector<16x1xi32>
    %c1_i32_22 = arith.constant 1 : i32
    %37 = tpu.dynamic_rotate %14 by %c1_i32_22 dim 0 : vector<16x128xf32>, i32 -> vector<16x128xf32>
    %cst_23 = arith.constant 0.000000e+00 : f32
    %38 = vector.shape_cast %36 : vector<16x1xi1> to vector<16x1xi1>
    %39 = vector.broadcast %38 : vector<16x1xi1> to vector<16x128xi1>
    %40 = vector.broadcast %cst_23 : f32 to vector<16x128xf32>
    %41 = arith.select %39, %40, %37 : vector<16x128xi1>, vector<16x128xf32>
    %c7_i32 = arith.constant 7 : i32
    %42 = vector.broadcast %c7_i32 : i32 to vector<16x1xi32>
    %43 = arith.cmpi eq, %34, %42 : vector<16x1xi32>
    %c15_i32 = arith.constant 15 : i32
    %44 = tpu.dynamic_rotate %17 by %c15_i32 dim 0 : vector<16x128xf32>, i32 -> vector<16x128xf32>
    %cst_24 = arith.constant 0.000000e+00 : f32
    %45 = vector.shape_cast %43 : vector<16x1xi1> to vector<16x1xi1>
    %46 = vector.broadcast %45 : vector<16x1xi1> to vector<16x128xi1>
    %47 = vector.broadcast %cst_24 : f32 to vector<16x128xf32>
    %48 = arith.select %46, %47, %44 : vector<16x128xi1>, vector<16x128xf32>
    %49 = arith.addf %11, %41 : vector<16x128xf32>
    %50 = arith.addf %49, %48 : vector<16x128xf32>
    %51 = vector.broadcast %8 : vector<1x128xf32> to vector<16x128xf32>
    %52 = arith.addf %50, %51 : vector<16x128xf32>
    %cst_25 = arith.constant 0.000000e+00 : f32
    %53 = vector.broadcast %cst_25 : f32 to vector<16x128xf32>
    %54 = arith.maximumf %52, %53 : vector<16x128xf32>
    %55 = arith.truncf %54 : vector<16x128xf32> to vector<16x128xbf16>
    %c0_26 = arith.constant 0 : index
    %c0_27 = arith.constant 0 : index
    %56 = vector.load %arg7[%c0_26, %c0_27] : memref<1x64xf32, #tpu.memory_space<vmem>>, vector<1x64xf32>
    %c1_28 = arith.constant 1 : index
    %c0_29 = arith.constant 0 : index
    %c0_30 = arith.constant 0 : index
    %57 = vector.load %arg6[%c1_28, %c0_29, %c0_30] : memref<3x128x64xbf16, #tpu.memory_space<vmem>>, vector<1x128x64xbf16>
    %58 = vector.shape_cast %57 : vector<1x128x64xbf16> to vector<128x64xbf16>
    %cst_31 = arith.constant dense<0.000000e+00> : vector<16x64xf32>
    %59 = tpu.matmul %55, %58, %cst_31 {dimension_numbers = #tpu.dot_dimension_numbers<[1], [0], [0], [1], [0, 0, 1, 1], [], []>} : vector<16x128xbf16>, vector<128x64xbf16>, vector<16x64xf32> -> vector<16x64xf32>
    %c0_32 = arith.constant 0 : index
    %c0_33 = arith.constant 0 : index
    %c0_34 = arith.constant 0 : index
    %60 = vector.load %arg6[%c0_32, %c0_33, %c0_34] : memref<3x128x64xbf16, #tpu.memory_space<vmem>>, vector<1x128x64xbf16>
    %61 = vector.shape_cast %60 : vector<1x128x64xbf16> to vector<128x64xbf16>
    %cst_35 = arith.constant dense<0.000000e+00> : vector<16x64xf32>
    %62 = tpu.matmul %55, %61, %cst_35 {dimension_numbers = #tpu.dot_dimension_numbers<[1], [0], [0], [1], [0, 0, 1, 1], [], []>} : vector<16x128xbf16>, vector<128x64xbf16>, vector<16x64xf32> -> vector<16x64xf32>
    %c2_36 = arith.constant 2 : index
    %c0_37 = arith.constant 0 : index
    %c0_38 = arith.constant 0 : index
    %63 = vector.load %arg6[%c2_36, %c0_37, %c0_38] : memref<3x128x64xbf16, #tpu.memory_space<vmem>>, vector<1x128x64xbf16>
    %64 = vector.shape_cast %63 : vector<1x128x64xbf16> to vector<128x64xbf16>
    %cst_39 = arith.constant dense<0.000000e+00> : vector<16x64xf32>
    %65 = tpu.matmul %55, %64, %cst_39 {dimension_numbers = #tpu.dot_dimension_numbers<[1], [0], [0], [1], [0, 0, 1, 1], [], []>} : vector<16x128xbf16>, vector<128x64xbf16>, vector<16x64xf32> -> vector<16x64xf32>
    %66 = tpu.iota {dimensions = array<i32: 0>} : vector<16x1xi32>
    %c8_i32_40 = arith.constant 8 : i32
    %c0_i32_41 = arith.constant 0 : i32
    %67 = arith.cmpi eq, %c8_i32_40, %c0_i32_41 : i32
    %c1_i32_42 = arith.constant 1 : i32
    %68 = arith.select %67, %c1_i32_42, %c8_i32_40 : i32
    %69 = vector.broadcast %68 : i32 to vector<16x1xi32>
    %70 = arith.remsi %66, %69 : vector<16x1xi32>
    %c0_i32_43 = arith.constant 0 : i32
    %71 = vector.broadcast %c0_i32_43 : i32 to vector<16x1xi32>
    %72 = arith.cmpi ne, %70, %71 : vector<16x1xi32>
    %c0_i32_44 = arith.constant 0 : i32
    %73 = vector.broadcast %c0_i32_44 : i32 to vector<16x1xi32>
    %74 = arith.cmpi slt, %70, %73 : vector<16x1xi32>
    %c0_i32_45 = arith.constant 0 : i32
    %75 = arith.cmpi slt, %68, %c0_i32_45 : i32
    %76 = vector.broadcast %75 : i1 to vector<16x1xi1>
    %77 = vector.broadcast %76 : vector<16x1xi1> to vector<16x1xi1>
    %78 = arith.xori %74, %77 : vector<16x1xi1>
    %79 = arith.andi %78, %72 : vector<16x1xi1>
    %80 = vector.broadcast %68 : i32 to vector<16x1xi32>
    %81 = arith.addi %70, %80 : vector<16x1xi32>
    %82 = arith.select %79, %81, %70 : vector<16x1xi1>, vector<16x1xi32>
    %c0_i32_46 = arith.constant 0 : i32
    %83 = vector.broadcast %c0_i32_46 : i32 to vector<16x1xi32>
    %84 = arith.cmpi eq, %82, %83 : vector<16x1xi32>
    %c1_i32_47 = arith.constant 1 : i32
    %85 = tpu.dynamic_rotate %62 by %c1_i32_47 dim 0 : vector<16x64xf32>, i32 -> vector<16x64xf32>
    %cst_48 = arith.constant 0.000000e+00 : f32
    %86 = vector.shape_cast %84 : vector<16x1xi1> to vector<16x1xi1>
    %87 = vector.broadcast %86 : vector<16x1xi1> to vector<16x64xi1>
    %88 = vector.broadcast %cst_48 : f32 to vector<16x64xf32>
    %89 = arith.select %87, %88, %85 : vector<16x64xi1>, vector<16x64xf32>
    %c7_i32_49 = arith.constant 7 : i32
    %90 = vector.broadcast %c7_i32_49 : i32 to vector<16x1xi32>
    %91 = arith.cmpi eq, %82, %90 : vector<16x1xi32>
    %c15_i32_50 = arith.constant 15 : i32
    %92 = tpu.dynamic_rotate %65 by %c15_i32_50 dim 0 : vector<16x64xf32>, i32 -> vector<16x64xf32>
    %cst_51 = arith.constant 0.000000e+00 : f32
    %93 = vector.shape_cast %91 : vector<16x1xi1> to vector<16x1xi1>
    %94 = vector.broadcast %93 : vector<16x1xi1> to vector<16x64xi1>
    %95 = vector.broadcast %cst_51 : f32 to vector<16x64xf32>
    %96 = arith.select %94, %95, %92 : vector<16x64xi1>, vector<16x64xf32>
    %97 = arith.addf %59, %89 : vector<16x64xf32>
    %98 = arith.addf %97, %96 : vector<16x64xf32>
    %99 = vector.broadcast %56 : vector<1x64xf32> to vector<16x64xf32>
    %100 = arith.addf %98, %99 : vector<16x64xf32>
    %cst_52 = arith.constant 0.000000e+00 : f32
    %101 = vector.broadcast %cst_52 : f32 to vector<16x64xf32>
    %102 = arith.maximumf %100, %101 : vector<16x64xf32>
    %103 = arith.truncf %102 : vector<16x64xf32> to vector<16x64xbf16>
    %c0_53 = arith.constant 0 : index
    %c0_54 = arith.constant 0 : index
    %104 = vector.load %arg8[%c0_53, %c0_54] : memref<64x192xbf16, #tpu.memory_space<vmem>>, vector<64x192xbf16>
    %cst_55 = arith.constant dense<0.000000e+00> : vector<16x192xf32>
    %105 = tpu.matmul %103, %104, %cst_55 {dimension_numbers = #tpu.dot_dimension_numbers<[1], [0], [0], [1], [0, 0, 1, 1], [], []>} : vector<16x64xbf16>, vector<64x192xbf16>, vector<16x192xf32> -> vector<16x192xf32>
    %c0_56 = arith.constant 0 : index
    %c0_57 = arith.constant 0 : index
    %106 = vector.load %arg9[%c0_56, %c0_57] : memref<1x192xf32, #tpu.memory_space<vmem>>, vector<1x192xf32>
    %107 = vector.broadcast %106 : vector<1x192xf32> to vector<16x192xf32>
    %108 = arith.addf %105, %107 : vector<16x192xf32>
    %109 = vector.extract_strided_slice %108 {offsets = [0, 0], sizes = [16, 64], strides = [1, 1]} : vector<16x192xf32> to vector<16x64xf32>
    %110 = vector.shape_cast %109 : vector<16x64xf32> to vector<2x8x64xf32>
    %111 = arith.truncf %110 : vector<2x8x64xf32> to vector<2x8x64xbf16>
    %112 = vector.extract_strided_slice %108 {offsets = [0, 64], sizes = [16, 64], strides = [1, 1]} : vector<16x192xf32> to vector<16x64xf32>
    %113 = vector.shape_cast %112 : vector<16x64xf32> to vector<2x8x64xf32>
    %114 = arith.truncf %113 : vector<2x8x64xf32> to vector<2x8x64xbf16>
    %115 = vector.extract_strided_slice %108 {offsets = [0, 128], sizes = [16, 64], strides = [1, 1]} : vector<16x192xf32> to vector<16x64xf32>
    %116 = vector.shape_cast %115 : vector<16x64xf32> to vector<2x8x64xf32>
    %117 = arith.truncf %116 : vector<2x8x64xf32> to vector<2x8x64xbf16>
    %118 = vector.extract_strided_slice %111 {offsets = [0, 0, 0], sizes = [2, 8, 8], strides = [1, 1, 1]} : vector<2x8x64xbf16> to vector<2x8x8xbf16>
    %119 = vector.extract_strided_slice %114 {offsets = [0, 0, 0], sizes = [2, 8, 8], strides = [1, 1, 1]} : vector<2x8x64xbf16> to vector<2x8x8xbf16>
    "tpu.trace_start"() <{level = 10 : i32, message = "bqd,bkd->bqk"}> : () -> ()
    %cst_58 = arith.constant dense<0.000000e+00> : vector<2x8x8xf32>
    %120 = tpu.matmul %118, %119, %cst_58 {dimension_numbers = #tpu.dot_dimension_numbers<[2], [2], [1], [1], [0, 0, 0, 1, 1, 1], [0], [0]>} : vector<2x8x8xbf16>, vector<2x8x8xbf16>, vector<2x8x8xf32> -> vector<2x8x8xf32>
    "tpu.trace_stop"() : () -> ()
    %cst_59 = arith.constant 0.353553385 : f32
    %121 = vector.broadcast %cst_59 : f32 to vector<2x8x8xf32>
    %122 = arith.mulf %120, %121 : vector<2x8x8xf32>
    %cst_60 = arith.constant dense<0xFF800000> : vector<2x8xf32>
    %123 = vector.multi_reduction <maximumf>, %122, %cst_60 [2] : vector<2x8x8xf32> to vector<2x8xf32>
    %124 = vector.shape_cast %123 : vector<2x8xf32> to vector<2x8x1xf32>
    %125 = vector.broadcast %124 : vector<2x8x1xf32> to vector<2x8x8xf32>
    %126 = arith.subf %122, %125 : vector<2x8x8xf32>
    %127 = math.exp %126 : vector<2x8x8xf32>
    %cst_61 = arith.constant dense<0.000000e+00> : vector<2x8xf32>
    %128 = vector.multi_reduction <add>, %127, %cst_61 [2] : vector<2x8x8xf32> to vector<2x8xf32>
    %129 = vector.shape_cast %128 : vector<2x8xf32> to vector<2x8x1xf32>
    %130 = tpu.reciprocal %129 {approx = true} : vector<2x8x1xf32> -> vector<2x8x1xf32>
    %131 = vector.broadcast %130 : vector<2x8x1xf32> to vector<2x8x8xf32>
    %132 = arith.mulf %127, %131 : vector<2x8x8xf32>
    %133 = arith.truncf %132 : vector<2x8x8xf32> to vector<2x8x8xbf16>
    %134 = vector.extract_strided_slice %117 {offsets = [0, 0, 0], sizes = [2, 8, 8], strides = [1, 1, 1]} : vector<2x8x64xbf16> to vector<2x8x8xbf16>
    "tpu.trace_start"() <{level = 10 : i32, message = "bqk,bkd->bqd"}> : () -> ()
    %cst_62 = arith.constant dense<0.000000e+00> : vector<2x8x8xf32>
    %135 = tpu.matmul %133, %134, %cst_62 {dimension_numbers = #tpu.dot_dimension_numbers<[2], [1], [1], [2], [0, 0, 0, 1, 1, 2], [0], [0]>} : vector<2x8x8xbf16>, vector<2x8x8xbf16>, vector<2x8x8xf32> -> vector<2x8x8xf32>
    "tpu.trace_stop"() : () -> ()
    %cst_63 = arith.constant dense<0.000000e+00> : vector<2x8xf32>
    %136 = vector.multi_reduction <add>, %135, %cst_63 [1] : vector<2x8x8xf32> to vector<2x8xf32>
    %cst_64 = arith.constant 8.000000e+00 : f32
    %137 = vector.broadcast %cst_64 : f32 to vector<2x8xf32>
    %138 = arith.divf %136, %137 : vector<2x8xf32>
    %139 = vector.extract_strided_slice %111 {offsets = [0, 0, 8], sizes = [2, 8, 8], strides = [1, 1, 1]} : vector<2x8x64xbf16> to vector<2x8x8xbf16>
    %140 = vector.extract_strided_slice %114 {offsets = [0, 0, 8], sizes = [2, 8, 8], strides = [1, 1, 1]} : vector<2x8x64xbf16> to vector<2x8x8xbf16>
    "tpu.trace_start"() <{level = 10 : i32, message = "bqd,bkd->bqk"}> : () -> ()
    %cst_65 = arith.constant dense<0.000000e+00> : vector<2x8x8xf32>
    %141 = tpu.matmul %139, %140, %cst_65 {dimension_numbers = #tpu.dot_dimension_numbers<[2], [2], [1], [1], [0, 0, 0, 1, 1, 1], [0], [0]>} : vector<2x8x8xbf16>, vector<2x8x8xbf16>, vector<2x8x8xf32> -> vector<2x8x8xf32>
    "tpu.trace_stop"() : () -> ()
    %cst_66 = arith.constant 0.353553385 : f32
    %142 = vector.broadcast %cst_66 : f32 to vector<2x8x8xf32>
    %143 = arith.mulf %141, %142 : vector<2x8x8xf32>
    %cst_67 = arith.constant dense<0xFF800000> : vector<2x8xf32>
    %144 = vector.multi_reduction <maximumf>, %143, %cst_67 [2] : vector<2x8x8xf32> to vector<2x8xf32>
    %145 = vector.shape_cast %144 : vector<2x8xf32> to vector<2x8x1xf32>
    %146 = vector.broadcast %145 : vector<2x8x1xf32> to vector<2x8x8xf32>
    %147 = arith.subf %143, %146 : vector<2x8x8xf32>
    %148 = math.exp %147 : vector<2x8x8xf32>
    %cst_68 = arith.constant dense<0.000000e+00> : vector<2x8xf32>
    %149 = vector.multi_reduction <add>, %148, %cst_68 [2] : vector<2x8x8xf32> to vector<2x8xf32>
    %150 = vector.shape_cast %149 : vector<2x8xf32> to vector<2x8x1xf32>
    %151 = tpu.reciprocal %150 {approx = true} : vector<2x8x1xf32> -> vector<2x8x1xf32>
    %152 = vector.broadcast %151 : vector<2x8x1xf32> to vector<2x8x8xf32>
    %153 = arith.mulf %148, %152 : vector<2x8x8xf32>
    %154 = arith.truncf %153 : vector<2x8x8xf32> to vector<2x8x8xbf16>
    %155 = vector.extract_strided_slice %117 {offsets = [0, 0, 8], sizes = [2, 8, 8], strides = [1, 1, 1]} : vector<2x8x64xbf16> to vector<2x8x8xbf16>
    "tpu.trace_start"() <{level = 10 : i32, message = "bqk,bkd->bqd"}> : () -> ()
    %cst_69 = arith.constant dense<0.000000e+00> : vector<2x8x8xf32>
    %156 = tpu.matmul %154, %155, %cst_69 {dimension_numbers = #tpu.dot_dimension_numbers<[2], [1], [1], [2], [0, 0, 0, 1, 1, 2], [0], [0]>} : vector<2x8x8xbf16>, vector<2x8x8xbf16>, vector<2x8x8xf32> -> vector<2x8x8xf32>
    "tpu.trace_stop"() : () -> ()
    %cst_70 = arith.constant dense<0.000000e+00> : vector<2x8xf32>
    %157 = vector.multi_reduction <add>, %156, %cst_70 [1] : vector<2x8x8xf32> to vector<2x8xf32>
    %cst_71 = arith.constant 8.000000e+00 : f32
    %158 = vector.broadcast %cst_71 : f32 to vector<2x8xf32>
    %159 = arith.divf %157, %158 : vector<2x8xf32>
    %160 = vector.extract_strided_slice %111 {offsets = [0, 0, 16], sizes = [2, 8, 8], strides = [1, 1, 1]} : vector<2x8x64xbf16> to vector<2x8x8xbf16>
    %161 = vector.extract_strided_slice %114 {offsets = [0, 0, 16], sizes = [2, 8, 8], strides = [1, 1, 1]} : vector<2x8x64xbf16> to vector<2x8x8xbf16>
    "tpu.trace_start"() <{level = 10 : i32, message = "bqd,bkd->bqk"}> : () -> ()
    %cst_72 = arith.constant dense<0.000000e+00> : vector<2x8x8xf32>
    %162 = tpu.matmul %160, %161, %cst_72 {dimension_numbers = #tpu.dot_dimension_numbers<[2], [2], [1], [1], [0, 0, 0, 1, 1, 1], [0], [0]>} : vector<2x8x8xbf16>, vector<2x8x8xbf16>, vector<2x8x8xf32> -> vector<2x8x8xf32>
    "tpu.trace_stop"() : () -> ()
    %cst_73 = arith.constant 0.353553385 : f32
    %163 = vector.broadcast %cst_73 : f32 to vector<2x8x8xf32>
    %164 = arith.mulf %162, %163 : vector<2x8x8xf32>
    %cst_74 = arith.constant dense<0xFF800000> : vector<2x8xf32>
    %165 = vector.multi_reduction <maximumf>, %164, %cst_74 [2] : vector<2x8x8xf32> to vector<2x8xf32>
    %166 = vector.shape_cast %165 : vector<2x8xf32> to vector<2x8x1xf32>
    %167 = vector.broadcast %166 : vector<2x8x1xf32> to vector<2x8x8xf32>
    %168 = arith.subf %164, %167 : vector<2x8x8xf32>
    %169 = math.exp %168 : vector<2x8x8xf32>
    %cst_75 = arith.constant dense<0.000000e+00> : vector<2x8xf32>
    %170 = vector.multi_reduction <add>, %169, %cst_75 [2] : vector<2x8x8xf32> to vector<2x8xf32>
    %171 = vector.shape_cast %170 : vector<2x8xf32> to vector<2x8x1xf32>
    %172 = tpu.reciprocal %171 {approx = true} : vector<2x8x1xf32> -> vector<2x8x1xf32>
    %173 = vector.broadcast %172 : vector<2x8x1xf32> to vector<2x8x8xf32>
    %174 = arith.mulf %169, %173 : vector<2x8x8xf32>
    %175 = arith.truncf %174 : vector<2x8x8xf32> to vector<2x8x8xbf16>
    %176 = vector.extract_strided_slice %117 {offsets = [0, 0, 16], sizes = [2, 8, 8], strides = [1, 1, 1]} : vector<2x8x64xbf16> to vector<2x8x8xbf16>
    "tpu.trace_start"() <{level = 10 : i32, message = "bqk,bkd->bqd"}> : () -> ()
    %cst_76 = arith.constant dense<0.000000e+00> : vector<2x8x8xf32>
    %177 = tpu.matmul %175, %176, %cst_76 {dimension_numbers = #tpu.dot_dimension_numbers<[2], [1], [1], [2], [0, 0, 0, 1, 1, 2], [0], [0]>} : vector<2x8x8xbf16>, vector<2x8x8xbf16>, vector<2x8x8xf32> -> vector<2x8x8xf32>
    "tpu.trace_stop"() : () -> ()
    %cst_77 = arith.constant dense<0.000000e+00> : vector<2x8xf32>
    %178 = vector.multi_reduction <add>, %177, %cst_77 [1] : vector<2x8x8xf32> to vector<2x8xf32>
    %cst_78 = arith.constant 8.000000e+00 : f32
    %179 = vector.broadcast %cst_78 : f32 to vector<2x8xf32>
    %180 = arith.divf %178, %179 : vector<2x8xf32>
    %181 = vector.extract_strided_slice %111 {offsets = [0, 0, 24], sizes = [2, 8, 8], strides = [1, 1, 1]} : vector<2x8x64xbf16> to vector<2x8x8xbf16>
    %182 = vector.extract_strided_slice %114 {offsets = [0, 0, 24], sizes = [2, 8, 8], strides = [1, 1, 1]} : vector<2x8x64xbf16> to vector<2x8x8xbf16>
    "tpu.trace_start"() <{level = 10 : i32, message = "bqd,bkd->bqk"}> : () -> ()
    %cst_79 = arith.constant dense<0.000000e+00> : vector<2x8x8xf32>
    %183 = tpu.matmul %181, %182, %cst_79 {dimension_numbers = #tpu.dot_dimension_numbers<[2], [2], [1], [1], [0, 0, 0, 1, 1, 1], [0], [0]>} : vector<2x8x8xbf16>, vector<2x8x8xbf16>, vector<2x8x8xf32> -> vector<2x8x8xf32>
    "tpu.trace_stop"() : () -> ()
    %cst_80 = arith.constant 0.353553385 : f32
    %184 = vector.broadcast %cst_80 : f32 to vector<2x8x8xf32>
    %185 = arith.mulf %183, %184 : vector<2x8x8xf32>
    %cst_81 = arith.constant dense<0xFF800000> : vector<2x8xf32>
    %186 = vector.multi_reduction <maximumf>, %185, %cst_81 [2] : vector<2x8x8xf32> to vector<2x8xf32>
    %187 = vector.shape_cast %186 : vector<2x8xf32> to vector<2x8x1xf32>
    %188 = vector.broadcast %187 : vector<2x8x1xf32> to vector<2x8x8xf32>
    %189 = arith.subf %185, %188 : vector<2x8x8xf32>
    %190 = math.exp %189 : vector<2x8x8xf32>
    %cst_82 = arith.constant dense<0.000000e+00> : vector<2x8xf32>
    %191 = vector.multi_reduction <add>, %190, %cst_82 [2] : vector<2x8x8xf32> to vector<2x8xf32>
    %192 = vector.shape_cast %191 : vector<2x8xf32> to vector<2x8x1xf32>
    %193 = tpu.reciprocal %192 {approx = true} : vector<2x8x1xf32> -> vector<2x8x1xf32>
    %194 = vector.broadcast %193 : vector<2x8x1xf32> to vector<2x8x8xf32>
    %195 = arith.mulf %190, %194 : vector<2x8x8xf32>
    %196 = arith.truncf %195 : vector<2x8x8xf32> to vector<2x8x8xbf16>
    %197 = vector.extract_strided_slice %117 {offsets = [0, 0, 24], sizes = [2, 8, 8], strides = [1, 1, 1]} : vector<2x8x64xbf16> to vector<2x8x8xbf16>
    "tpu.trace_start"() <{level = 10 : i32, message = "bqk,bkd->bqd"}> : () -> ()
    %cst_83 = arith.constant dense<0.000000e+00> : vector<2x8x8xf32>
    %198 = tpu.matmul %196, %197, %cst_83 {dimension_numbers = #tpu.dot_dimension_numbers<[2], [1], [1], [2], [0, 0, 0, 1, 1, 2], [0], [0]>} : vector<2x8x8xbf16>, vector<2x8x8xbf16>, vector<2x8x8xf32> -> vector<2x8x8xf32>
    "tpu.trace_stop"() : () -> ()
    %cst_84 = arith.constant dense<0.000000e+00> : vector<2x8xf32>
    %199 = vector.multi_reduction <add>, %198, %cst_84 [1] : vector<2x8x8xf32> to vector<2x8xf32>
    %cst_85 = arith.constant 8.000000e+00 : f32
    %200 = vector.broadcast %cst_85 : f32 to vector<2x8xf32>
    %201 = arith.divf %199, %200 : vector<2x8xf32>
    %202 = vector.extract_strided_slice %111 {offsets = [0, 0, 32], sizes = [2, 8, 8], strides = [1, 1, 1]} : vector<2x8x64xbf16> to vector<2x8x8xbf16>
    %203 = vector.extract_strided_slice %114 {offsets = [0, 0, 32], sizes = [2, 8, 8], strides = [1, 1, 1]} : vector<2x8x64xbf16> to vector<2x8x8xbf16>
    "tpu.trace_start"() <{level = 10 : i32, message = "bqd,bkd->bqk"}> : () -> ()
    %cst_86 = arith.constant dense<0.000000e+00> : vector<2x8x8xf32>
    %204 = tpu.matmul %202, %203, %cst_86 {dimension_numbers = #tpu.dot_dimension_numbers<[2], [2], [1], [1], [0, 0, 0, 1, 1, 1], [0], [0]>} : vector<2x8x8xbf16>, vector<2x8x8xbf16>, vector<2x8x8xf32> -> vector<2x8x8xf32>
    "tpu.trace_stop"() : () -> ()
    %cst_87 = arith.constant 0.353553385 : f32
    %205 = vector.broadcast %cst_87 : f32 to vector<2x8x8xf32>
    %206 = arith.mulf %204, %205 : vector<2x8x8xf32>
    %cst_88 = arith.constant dense<0xFF800000> : vector<2x8xf32>
    %207 = vector.multi_reduction <maximumf>, %206, %cst_88 [2] : vector<2x8x8xf32> to vector<2x8xf32>
    %208 = vector.shape_cast %207 : vector<2x8xf32> to vector<2x8x1xf32>
    %209 = vector.broadcast %208 : vector<2x8x1xf32> to vector<2x8x8xf32>
    %210 = arith.subf %206, %209 : vector<2x8x8xf32>
    %211 = math.exp %210 : vector<2x8x8xf32>
    %cst_89 = arith.constant dense<0.000000e+00> : vector<2x8xf32>
    %212 = vector.multi_reduction <add>, %211, %cst_89 [2] : vector<2x8x8xf32> to vector<2x8xf32>
    %213 = vector.shape_cast %212 : vector<2x8xf32> to vector<2x8x1xf32>
    %214 = tpu.reciprocal %213 {approx = true} : vector<2x8x1xf32> -> vector<2x8x1xf32>
    %215 = vector.broadcast %214 : vector<2x8x1xf32> to vector<2x8x8xf32>
    %216 = arith.mulf %211, %215 : vector<2x8x8xf32>
    %217 = arith.truncf %216 : vector<2x8x8xf32> to vector<2x8x8xbf16>
    %218 = vector.extract_strided_slice %117 {offsets = [0, 0, 32], sizes = [2, 8, 8], strides = [1, 1, 1]} : vector<2x8x64xbf16> to vector<2x8x8xbf16>
    "tpu.trace_start"() <{level = 10 : i32, message = "bqk,bkd->bqd"}> : () -> ()
    %cst_90 = arith.constant dense<0.000000e+00> : vector<2x8x8xf32>
    %219 = tpu.matmul %217, %218, %cst_90 {dimension_numbers = #tpu.dot_dimension_numbers<[2], [1], [1], [2], [0, 0, 0, 1, 1, 2], [0], [0]>} : vector<2x8x8xbf16>, vector<2x8x8xbf16>, vector<2x8x8xf32> -> vector<2x8x8xf32>
    "tpu.trace_stop"() : () -> ()
    %cst_91 = arith.constant dense<0.000000e+00> : vector<2x8xf32>
    %220 = vector.multi_reduction <add>, %219, %cst_91 [1] : vector<2x8x8xf32> to vector<2x8xf32>
    %cst_92 = arith.constant 8.000000e+00 : f32
    %221 = vector.broadcast %cst_92 : f32 to vector<2x8xf32>
    %222 = arith.divf %220, %221 : vector<2x8xf32>
    %223 = vector.extract_strided_slice %111 {offsets = [0, 0, 40], sizes = [2, 8, 8], strides = [1, 1, 1]} : vector<2x8x64xbf16> to vector<2x8x8xbf16>
    %224 = vector.extract_strided_slice %114 {offsets = [0, 0, 40], sizes = [2, 8, 8], strides = [1, 1, 1]} : vector<2x8x64xbf16> to vector<2x8x8xbf16>
    "tpu.trace_start"() <{level = 10 : i32, message = "bqd,bkd->bqk"}> : () -> ()
    %cst_93 = arith.constant dense<0.000000e+00> : vector<2x8x8xf32>
    %225 = tpu.matmul %223, %224, %cst_93 {dimension_numbers = #tpu.dot_dimension_numbers<[2], [2], [1], [1], [0, 0, 0, 1, 1, 1], [0], [0]>} : vector<2x8x8xbf16>, vector<2x8x8xbf16>, vector<2x8x8xf32> -> vector<2x8x8xf32>
    "tpu.trace_stop"() : () -> ()
    %cst_94 = arith.constant 0.353553385 : f32
    %226 = vector.broadcast %cst_94 : f32 to vector<2x8x8xf32>
    %227 = arith.mulf %225, %226 : vector<2x8x8xf32>
    %cst_95 = arith.constant dense<0xFF800000> : vector<2x8xf32>
    %228 = vector.multi_reduction <maximumf>, %227, %cst_95 [2] : vector<2x8x8xf32> to vector<2x8xf32>
    %229 = vector.shape_cast %228 : vector<2x8xf32> to vector<2x8x1xf32>
    %230 = vector.broadcast %229 : vector<2x8x1xf32> to vector<2x8x8xf32>
    %231 = arith.subf %227, %230 : vector<2x8x8xf32>
    %232 = math.exp %231 : vector<2x8x8xf32>
    %cst_96 = arith.constant dense<0.000000e+00> : vector<2x8xf32>
    %233 = vector.multi_reduction <add>, %232, %cst_96 [2] : vector<2x8x8xf32> to vector<2x8xf32>
    %234 = vector.shape_cast %233 : vector<2x8xf32> to vector<2x8x1xf32>
    %235 = tpu.reciprocal %234 {approx = true} : vector<2x8x1xf32> -> vector<2x8x1xf32>
    %236 = vector.broadcast %235 : vector<2x8x1xf32> to vector<2x8x8xf32>
    %237 = arith.mulf %232, %236 : vector<2x8x8xf32>
    %238 = arith.truncf %237 : vector<2x8x8xf32> to vector<2x8x8xbf16>
    %239 = vector.extract_strided_slice %117 {offsets = [0, 0, 40], sizes = [2, 8, 8], strides = [1, 1, 1]} : vector<2x8x64xbf16> to vector<2x8x8xbf16>
    "tpu.trace_start"() <{level = 10 : i32, message = "bqk,bkd->bqd"}> : () -> ()
    %cst_97 = arith.constant dense<0.000000e+00> : vector<2x8x8xf32>
    %240 = tpu.matmul %238, %239, %cst_97 {dimension_numbers = #tpu.dot_dimension_numbers<[2], [1], [1], [2], [0, 0, 0, 1, 1, 2], [0], [0]>} : vector<2x8x8xbf16>, vector<2x8x8xbf16>, vector<2x8x8xf32> -> vector<2x8x8xf32>
    "tpu.trace_stop"() : () -> ()
    %cst_98 = arith.constant dense<0.000000e+00> : vector<2x8xf32>
    %241 = vector.multi_reduction <add>, %240, %cst_98 [1] : vector<2x8x8xf32> to vector<2x8xf32>
    %cst_99 = arith.constant 8.000000e+00 : f32
    %242 = vector.broadcast %cst_99 : f32 to vector<2x8xf32>
    %243 = arith.divf %241, %242 : vector<2x8xf32>
    %244 = vector.extract_strided_slice %111 {offsets = [0, 0, 48], sizes = [2, 8, 8], strides = [1, 1, 1]} : vector<2x8x64xbf16> to vector<2x8x8xbf16>
    %245 = vector.extract_strided_slice %114 {offsets = [0, 0, 48], sizes = [2, 8, 8], strides = [1, 1, 1]} : vector<2x8x64xbf16> to vector<2x8x8xbf16>
    "tpu.trace_start"() <{level = 10 : i32, message = "bqd,bkd->bqk"}> : () -> ()
    %cst_100 = arith.constant dense<0.000000e+00> : vector<2x8x8xf32>
    %246 = tpu.matmul %244, %245, %cst_100 {dimension_numbers = #tpu.dot_dimension_numbers<[2], [2], [1], [1], [0, 0, 0, 1, 1, 1], [0], [0]>} : vector<2x8x8xbf16>, vector<2x8x8xbf16>, vector<2x8x8xf32> -> vector<2x8x8xf32>
    "tpu.trace_stop"() : () -> ()
    %cst_101 = arith.constant 0.353553385 : f32
    %247 = vector.broadcast %cst_101 : f32 to vector<2x8x8xf32>
    %248 = arith.mulf %246, %247 : vector<2x8x8xf32>
    %cst_102 = arith.constant dense<0xFF800000> : vector<2x8xf32>
    %249 = vector.multi_reduction <maximumf>, %248, %cst_102 [2] : vector<2x8x8xf32> to vector<2x8xf32>
    %250 = vector.shape_cast %249 : vector<2x8xf32> to vector<2x8x1xf32>
    %251 = vector.broadcast %250 : vector<2x8x1xf32> to vector<2x8x8xf32>
    %252 = arith.subf %248, %251 : vector<2x8x8xf32>
    %253 = math.exp %252 : vector<2x8x8xf32>
    %cst_103 = arith.constant dense<0.000000e+00> : vector<2x8xf32>
    %254 = vector.multi_reduction <add>, %253, %cst_103 [2] : vector<2x8x8xf32> to vector<2x8xf32>
    %255 = vector.shape_cast %254 : vector<2x8xf32> to vector<2x8x1xf32>
    %256 = tpu.reciprocal %255 {approx = true} : vector<2x8x1xf32> -> vector<2x8x1xf32>
    %257 = vector.broadcast %256 : vector<2x8x1xf32> to vector<2x8x8xf32>
    %258 = arith.mulf %253, %257 : vector<2x8x8xf32>
    %259 = arith.truncf %258 : vector<2x8x8xf32> to vector<2x8x8xbf16>
    %260 = vector.extract_strided_slice %117 {offsets = [0, 0, 48], sizes = [2, 8, 8], strides = [1, 1, 1]} : vector<2x8x64xbf16> to vector<2x8x8xbf16>
    "tpu.trace_start"() <{level = 10 : i32, message = "bqk,bkd->bqd"}> : () -> ()
    %cst_104 = arith.constant dense<0.000000e+00> : vector<2x8x8xf32>
    %261 = tpu.matmul %259, %260, %cst_104 {dimension_numbers = #tpu.dot_dimension_numbers<[2], [1], [1], [2], [0, 0, 0, 1, 1, 2], [0], [0]>} : vector<2x8x8xbf16>, vector<2x8x8xbf16>, vector<2x8x8xf32> -> vector<2x8x8xf32>
    "tpu.trace_stop"() : () -> ()
    %cst_105 = arith.constant dense<0.000000e+00> : vector<2x8xf32>
    %262 = vector.multi_reduction <add>, %261, %cst_105 [1] : vector<2x8x8xf32> to vector<2x8xf32>
    %cst_106 = arith.constant 8.000000e+00 : f32
    %263 = vector.broadcast %cst_106 : f32 to vector<2x8xf32>
    %264 = arith.divf %262, %263 : vector<2x8xf32>
    %265 = vector.extract_strided_slice %111 {offsets = [0, 0, 56], sizes = [2, 8, 8], strides = [1, 1, 1]} : vector<2x8x64xbf16> to vector<2x8x8xbf16>
    %266 = vector.extract_strided_slice %114 {offsets = [0, 0, 56], sizes = [2, 8, 8], strides = [1, 1, 1]} : vector<2x8x64xbf16> to vector<2x8x8xbf16>
    "tpu.trace_start"() <{level = 10 : i32, message = "bqd,bkd->bqk"}> : () -> ()
    %cst_107 = arith.constant dense<0.000000e+00> : vector<2x8x8xf32>
    %267 = tpu.matmul %265, %266, %cst_107 {dimension_numbers = #tpu.dot_dimension_numbers<[2], [2], [1], [1], [0, 0, 0, 1, 1, 1], [0], [0]>} : vector<2x8x8xbf16>, vector<2x8x8xbf16>, vector<2x8x8xf32> -> vector<2x8x8xf32>
    "tpu.trace_stop"() : () -> ()
    %cst_108 = arith.constant 0.353553385 : f32
    %268 = vector.broadcast %cst_108 : f32 to vector<2x8x8xf32>
    %269 = arith.mulf %267, %268 : vector<2x8x8xf32>
    %cst_109 = arith.constant dense<0xFF800000> : vector<2x8xf32>
    %270 = vector.multi_reduction <maximumf>, %269, %cst_109 [2] : vector<2x8x8xf32> to vector<2x8xf32>
    %271 = vector.shape_cast %270 : vector<2x8xf32> to vector<2x8x1xf32>
    %272 = vector.broadcast %271 : vector<2x8x1xf32> to vector<2x8x8xf32>
    %273 = arith.subf %269, %272 : vector<2x8x8xf32>
    %274 = math.exp %273 : vector<2x8x8xf32>
    %cst_110 = arith.constant dense<0.000000e+00> : vector<2x8xf32>
    %275 = vector.multi_reduction <add>, %274, %cst_110 [2] : vector<2x8x8xf32> to vector<2x8xf32>
    %276 = vector.shape_cast %275 : vector<2x8xf32> to vector<2x8x1xf32>
    %277 = tpu.reciprocal %276 {approx = true} : vector<2x8x1xf32> -> vector<2x8x1xf32>
    %278 = vector.broadcast %277 : vector<2x8x1xf32> to vector<2x8x8xf32>
    %279 = arith.mulf %274, %278 : vector<2x8x8xf32>
    %280 = arith.truncf %279 : vector<2x8x8xf32> to vector<2x8x8xbf16>
    %281 = vector.extract_strided_slice %117 {offsets = [0, 0, 56], sizes = [2, 8, 8], strides = [1, 1, 1]} : vector<2x8x64xbf16> to vector<2x8x8xbf16>
    "tpu.trace_start"() <{level = 10 : i32, message = "bqk,bkd->bqd"}> : () -> ()
    %cst_111 = arith.constant dense<0.000000e+00> : vector<2x8x8xf32>
    %282 = tpu.matmul %280, %281, %cst_111 {dimension_numbers = #tpu.dot_dimension_numbers<[2], [1], [1], [2], [0, 0, 0, 1, 1, 2], [0], [0]>} : vector<2x8x8xbf16>, vector<2x8x8xbf16>, vector<2x8x8xf32> -> vector<2x8x8xf32>
    "tpu.trace_stop"() : () -> ()
    %cst_112 = arith.constant dense<0.000000e+00> : vector<2x8xf32>
    %283 = vector.multi_reduction <add>, %282, %cst_112 [1] : vector<2x8x8xf32> to vector<2x8xf32>
    %cst_113 = arith.constant 8.000000e+00 : f32
    %284 = vector.broadcast %cst_113 : f32 to vector<2x8xf32>
    %285 = arith.divf %283, %284 : vector<2x8xf32>
    %286 = tpu.concatenate %138, %159, %180, %201, %222, %243, %264, %285 in 1 : vector<2x8xf32>, vector<2x8xf32>, vector<2x8xf32>, vector<2x8xf32>, vector<2x8xf32>, vector<2x8xf32>, vector<2x8xf32>, vector<2x8xf32> -> vector<2x64xf32>
    %287 = arith.truncf %286 : vector<2x64xf32> to vector<2x64xbf16>
    %c0_114 = arith.constant 0 : index
    %c0_115 = arith.constant 0 : index
    %288 = vector.load %arg10[%c0_114, %c0_115] : memref<64x64xbf16, #tpu.memory_space<vmem>>, vector<64x64xbf16>
    %cst_116 = arith.constant dense<0.000000e+00> : vector<2x64xf32>
    %289 = tpu.matmul %287, %288, %cst_116 {dimension_numbers = #tpu.dot_dimension_numbers<[1], [0], [0], [1], [0, 0, 1, 1], [], []>} : vector<2x64xbf16>, vector<64x64xbf16>, vector<2x64xf32> -> vector<2x64xf32>
    %c0_117 = arith.constant 0 : index
    %c0_118 = arith.constant 0 : index
    %290 = vector.load %arg11[%c0_117, %c0_118] : memref<1x64xf32, #tpu.memory_space<vmem>>, vector<1x64xf32>
    %291 = vector.broadcast %290 : vector<1x64xf32> to vector<2x64xf32>
    %292 = arith.addf %289, %291 : vector<2x64xf32>
    %293 = arith.truncf %292 : vector<2x64xf32> to vector<2x64xbf16>
    %c0_119 = arith.constant 0 : index
    %c0_120 = arith.constant 0 : index
    %294 = vector.load %arg12[%c0_119, %c0_120] : memref<64x8xbf16, #tpu.memory_space<vmem>>, vector<64x8xbf16>
    %cst_121 = arith.constant dense<0.000000e+00> : vector<2x8xf32>
    %295 = tpu.matmul %293, %294, %cst_121 {dimension_numbers = #tpu.dot_dimension_numbers<[1], [0], [0], [1], [0, 0, 1, 1], [], []>} : vector<2x64xbf16>, vector<64x8xbf16>, vector<2x8xf32> -> vector<2x8xf32>
    %c0_122 = arith.constant 0 : index
    %c0_123 = arith.constant 0 : index
    %296 = vector.load %arg13[%c0_122, %c0_123] : memref<1x8xf32, #tpu.memory_space<vmem>>, vector<1x8xf32>
    %297 = vector.broadcast %296 : vector<1x8xf32> to vector<2x8xf32>
    %298 = arith.addf %295, %297 : vector<2x8xf32>
    %c0_124 = arith.constant 0 : index
    %c0_125 = arith.constant 0 : index
    %299 = vector.load %arg14[%c0_124, %c0_125] : memref<2x8xf32, #tpu.memory_space<vmem>>, vector<2x8xf32>
    tpu.vector_store %arg14[%c0_124, %c0_125], %298 {strides = array<i32>} : memref<2x8xf32, #tpu.memory_space<vmem>>, vector<2x8xf32>,
    return
  }
  func.func @transform_0(%arg0: i32) -> (i32, i32, i32) {
    %c0_i32 = arith.constant 0 : i32
    %c0_i32_0 = arith.constant 0 : i32
    %c0_i32_1 = arith.constant 0 : i32
    return %arg0, %c0_i32, %c0_i32_0 : i32, i32, i32
  }
  func.func @transform_1(%arg0: i32) -> (i32, i32) {
    %c0_i32 = arith.constant 0 : i32
    %c0_i32_0 = arith.constant 0 : i32
    %c0_i32_1 = arith.constant 0 : i32
    return %c0_i32, %c0_i32_0 : i32, i32
  }
  func.func @transform_2(%arg0: i32) -> (i32, i32) {
    %c0_i32 = arith.constant 0 : i32
    %c0_i32_0 = arith.constant 0 : i32
    %c0_i32_1 = arith.constant 0 : i32
    return %c0_i32, %c0_i32_0 : i32, i32
  }
  func.func @transform_3(%arg0: i32) -> (i32, i32, i32) {
    %c0_i32 = arith.constant 0 : i32
    %c0_i32_0 = arith.constant 0 : i32
    %c0_i32_1 = arith.constant 0 : i32
    %c0_i32_2 = arith.constant 0 : i32
    return %c0_i32, %c0_i32_0, %c0_i32_1 : i32, i32, i32
  }
  func.func @transform_4(%arg0: i32) -> (i32, i32) {
    %c0_i32 = arith.constant 0 : i32
    %c0_i32_0 = arith.constant 0 : i32
    %c0_i32_1 = arith.constant 0 : i32
    return %c0_i32, %c0_i32_0 : i32, i32
  }
  func.func @transform_5(%arg0: i32) -> (i32, i32, i32) {
    %c0_i32 = arith.constant 0 : i32
    %c0_i32_0 = arith.constant 0 : i32
    %c0_i32_1 = arith.constant 0 : i32
    %c0_i32_2 = arith.constant 0 : i32
    return %c0_i32, %c0_i32_0, %c0_i32_1 : i32, i32, i32
  }
  func.func @transform_6(%arg0: i32) -> (i32, i32) {
    %c0_i32 = arith.constant 0 : i32
    %c0_i32_0 = arith.constant 0 : i32
    %c0_i32_1 = arith.constant 0 : i32
    return %c0_i32, %c0_i32_0 : i32, i32
  }
  func.func @transform_7(%arg0: i32) -> (i32, i32) {
    %c0_i32 = arith.constant 0 : i32
    %c0_i32_0 = arith.constant 0 : i32
    %c0_i32_1 = arith.constant 0 : i32
    return %c0_i32, %c0_i32_0 : i32, i32
  }
  func.func @transform_8(%arg0: i32) -> (i32, i32) {
    %c0_i32 = arith.constant 0 : i32
    %c0_i32_0 = arith.constant 0 : i32
    %c0_i32_1 = arith.constant 0 : i32
    return %c0_i32, %c0_i32_0 : i32, i32
  }
  func.func @transform_9(%arg0: i32) -> (i32, i32) {
    %c0_i32 = arith.constant 0 : i32
    %c0_i32_0 = arith.constant 0 : i32
    %c0_i32_1 = arith.constant 0 : i32
    return %c0_i32, %c0_i32_0 : i32, i32
  }
  func.func @transform_10(%arg0: i32) -> (i32, i32) {
    %c0_i32 = arith.constant 0 : i32
    %c0_i32_0 = arith.constant 0 : i32
    %c0_i32_1 = arith.constant 0 : i32
    return %c0_i32, %c0_i32_0 : i32, i32
  }
  func.func @transform_11(%arg0: i32) -> (i32, i32) {
    %c0_i32 = arith.constant 0 : i32
    %c0_i32_0 = arith.constant 0 : i32
    %c0_i32_1 = arith.constant 0 : i32
    return %c0_i32, %c0_i32_0 : i32, i32
  }
  func.func @transform_12(%arg0: i32) -> (i32, i32) {
    %c0_i32 = arith.constant 0 : i32
    %c0_i32_0 = arith.constant 0 : i32
    %c0_i32_1 = arith.constant 0 : i32
    return %c0_i32, %c0_i32_0 : i32, i32
  }
  func.func @transform_13(%arg0: i32) -> (i32, i32) {
    %c0_i32 = arith.constant 0 : i32
    %c0_i32_0 = arith.constant 0 : i32
    return %arg0, %c0_i32 : i32, i32
  }
}

</mosaic_0001>

<bundles_post_ra>
// kernel: cnn_attention_model_swin2.1
= control target key start
LH: loop header
LB: loop body
LE: loop exit
PB: predicated region body
PF: predicated region fallthrough
CT: control target
= control target key end

     0   :  { %vm175_vm0 = vcmask 392192   ;;  %s5990_s0 = inlined_call_operand.vmem [shape: bf16[2,8,48], index: 0, kind: input, shape index: {}]   ;;  %s5991_s1 = inlined_call_operand.vmem [shape: bf16[48,768], index: 1, kind: input, shape index: {}]   ;;  %s5992_s2 = inlined_call_operand.vmem [shape: f32[1,768], index: 2, kind: input, shape index: {}]   ;;  %s5993_s3 = inlined_call_operand.vmem [shape: bf16[3,768,128], index: 3, kind: input, shape index: {}]   ;;  %s5994_s4 = inlined_call_operand.vmem [shape: f32[1,128], index: 4, kind: input, shape index: {}]   ;;  %s5995_s5 = inlined_call_operand.vmem [shape: bf16[3,128,64], index: 5, kind: input, shape index: {}]   ;;  %s5996_s6 = inlined_call_operand.vmem [shape: f32[1,64], index: 6, kind: input, shape index: {}]   ;;  %s5997_s7 = inlined_call_operand.vmem [shape: bf16[64,192], index: 7, kind: input, shape index: {}]   ;;  %s5998_s8 = inlined_call_operand.vmem [shape: f32[1,192], index: 8, kind: input, shape index: {}]   ;;  %s5999_s9 = inlined_call_operand.vmem [shape: bf16[64,64], index: 9, kind: input, shape index: {}]   ;;  %s6000_s10 = inlined_call_operand.vmem [shape: f32[1,64], index: 10, kind: input, shape index: {}]   ;;  %s6001_s11 = inlined_call_operand.vmem [shape: bf16[64,8], index: 11, kind: input, shape index: {}]   ;;  %s6002_s12 = inlined_call_operand.vmem [shape: f32[1,8], index: 12, kind: input, shape index: {}]   ;;  %s6003_s13 = inlined_call_operand.hbm [shape: f32[2,8], index: 13, kind: output, shape index: {}]  }
   0x1   :  { %v3378_v0 = vld [vmem:[%s5991_s1 + $0x60] sm:$0xf]  ;;  %v4418_v1 = vld [vmem:[%s5991_s1 + $0x74] sm:$0xf0]  ;;  %v4415_v2 = vld [vmem:[%s5991_s1 + $0x64] sm:$0xf] }
   0x2   :  { %v3379_v3 = vor.u32 %v4418_v1, %v3378_v0  ;;  %v3380_v4 = vld [vmem:[%s5991_s1 + $0x78] sm:$0xf0]  ;;  %v3386_v5 = vld [vmem:[%s5991_s1 + $0x68] sm:$0xf]  ;;  %v4419_v6 = vld [vmem:[%s5991_s1 + $0x7c] sm:$0xf0] }
   0x3   :  { %v3383_v7 = vor.u32 %v4415_v2, %v3380_v4  ;;  %v3387_v8 = vor.u32 %v4419_v6, %v3386_v5  ;;  %v4416_v9 = vld [vmem:[%s5991_s1 + $0x6c] sm:$0xf]  ;;  %v3388_v10 = vld [vmem:[%s5991_s1 + $0x80] sm:$0xf0]  ;;  %v3354_v11 = vld [vmem:[%s5991_s1 + $0x30] sm:$0xf] }
   0x4   :  { %184 = vmatpush.bf16.msra.mxu0 %v3379_v3  ;;  %v3391_v12 = vor.u32 %v4416_v9, %v3388_v10  ;;  %v4412_v13 = vld [vmem:[%s5991_s1 + $0x44] sm:$0xf0]  ;;  %v4409_v14 = vld [vmem:[%s5991_s1 + $0x34] sm:$0xf]  ;;  %v3356_v15 = vld [vmem:[%s5991_s1 + $0x48] sm:$0xf0] }
   0x5   :  { %198 = vmatpush.bf16.msra.mxu1 %v3383_v7  ;;  %212 = vmatpush.bf16.msra.mxu2 %v3387_v8  ;;  %v3355_v16 = vor.u32 %v4412_v13, %v3354_v11  ;;  %v3359_v17 = vor.u32 %v4409_v14, %v3356_v15  ;;  %v3362_v18 = vld [vmem:[%s5991_s1 + $0x38] sm:$0xf]  ;;  %v4413_v19 = vld [vmem:[%s5991_s1 + $0x4c] sm:$0xf0]  ;;  %v4410_v20 = vld [vmem:[%s5991_s1 + $0x3c] sm:$0xf] }
   0x6   :  { %226 = vmatpush.bf16.msra.mxu3 %v3391_v12  ;;  %v3363_v21 = vor.u32 %v4413_v19, %v3362_v18  ;;  %v3364_v22 = vld [vmem:[%s5991_s1 + $0x50] sm:$0xf0]  ;;  %v3330_v23 = vld [vmem:[%s5991_s1] sm:$0xf]  ;;  %v4406_v24 = vld [vmem:[%s5991_s1 + $0x14] sm:$0xf0] }
   0x7   :  { %v3367_v25 = vor.u32 %v4410_v20, %v3364_v22  ;;  %v4403_v26 = vld [vmem:[%s5991_s1 + $0x4] sm:$0xf]  ;;  %v3332_v27 = vld [vmem:[%s5991_s1 + $0x18] sm:$0xf0]  ;;  %v3338_v28 = vld [vmem:[%s5991_s1 + $0x8] sm:$0xf]  ;;  %v3331_v29 = vor.u32 %v4406_v24, %v3330_v23 }
   0x8   :  { %185 = vmatpush.bf16.msra.mxu0 %v3355_v16  ;;  %v4407_v30 = vld [vmem:[%s5991_s1 + $0x1c] sm:$0xf0]  ;;  %v4404_v31 = vld [vmem:[%s5991_s1 + $0xc] sm:$0xf]  ;;  %v3340_v32 = vld [vmem:[%s5991_s1 + $0x20] sm:$0xf0]  ;;  %v3335_v33 = vor.u32 %v4403_v26, %v3332_v27 }
   0x9   :  { %199 = vmatpush.bf16.msra.mxu1 %v3359_v17  ;;  %213 = vmatpush.bf16.msra.mxu2 %v3363_v21  ;;  %v3339_v34 = vor.u32 %v4407_v30, %v3338_v28  ;;  %v3394_v35 = vld [vmem:[%s5991_s1 + $0x70] sm:$0xf]  ;;  %v4420_v36 = vld [vmem:[%s5991_s1 + $0x84] sm:$0xf0]  ;;  %v3343_v37 = vor.u32 %v4404_v31, %v3340_v32  ;;  %v4417_v39 = vld [vmem:[%s5991_s1 + $0x74] sm:$0xf] }
   0xa   :  { %227 = vmatpush.bf16.msra.mxu3 %v3367_v25  ;;  %v3395_v38 = vor.u32 %v4420_v36, %v3394_v35  ;;  %v3396_v40 = vld [vmem:[%s5991_s1 + $0x88] sm:$0xf0]  ;;  %v4402_v41 = vld [vmem:[%s5990_s0] sm:$0xff]  ;;  %v4414_v44 = vld [vmem:[%s5991_s1 + $0x54] sm:$0xf0] }
   0xb   :  { %v3399_v42 = vor.u32 %v4417_v39, %v3396_v40  ;;  %v3370_v43 = vld [vmem:[%s5991_s1 + $0x40] sm:$0xf]  ;;  %v4411_v45 = vld [vmem:[%s5991_s1 + $0x44] sm:$0xf]  ;;  %v3372_v46 = vld [vmem:[%s5991_s1 + $0x58] sm:$0xf0] }
   0xc   :  { %186 = vmatpush.bf16.msra.mxu0 %v3331_v29  ;;  %v4476_v47 = vld [vmem:[%s5993_s3 + $0x38] sm:$0xff]  ;;  %v3371_v48 = vor.u32 %v4414_v44, %v3370_v43  ;;  %v3375_v50 = vor.u32 %v4411_v45, %v3372_v46  ;;  %v3346_v51 = vld [vmem:[%s5991_s1 + $0x10] sm:$0xf]  ;;  %v4408_v52 = vld [vmem:[%s5991_s1 + $0x24] sm:$0xf0] }
   0xd   :  { %200 = vmatpush.bf16.msra.mxu1 %v3335_v33  ;;  %214 = vmatpush.bf16.msra.mxu2 %v3339_v34  ;;  %v4484_v49 = vld [vmem:[%s5993_s3 + $0x78] sm:$0xff]  ;;  %v4405_v53 = vld [vmem:[%s5991_s1 + $0x14] sm:$0xf]  ;;  %v3348_v54 = vld [vmem:[%s5991_s1 + $0x28] sm:$0xf0]  ;;  %v3347_v56 = vor.u32 %v4408_v52, %v3346_v51 }
   0xe   :  { %228 = vmatpush.bf16.msra.mxu3 %v3343_v37  ;;  %v4475_v55 = vld [vmem:[%s5993_s3 + $0x30] sm:$0xff]  ;;  %v3351_v58 = vor.u32 %v4405_v53, %v3348_v54  ;;  %v4492_v59 = vld [vmem:[%s5993_s3 + $0xb8] sm:$0xff]  ;;  %v4474_v61 = vld [vmem:[%s5993_s3 + $0x28] sm:$0xff] }
   0xf   :  { %3400 = vmatmul.msk.bf16.vlgmr.msra.gmra.mxu0 %vm175_vm0, %v4402_v41  ;;  %v4483_v57 = vld [vmem:[%s5993_s3 + $0x70] sm:$0xff]  ;;  %v4500_v60 = vld [vmem:[%s5993_s3 + $0xf8] sm:$0xff]  ;;  %v4482_v62 = vld [vmem:[%s5993_s3 + $0x68] sm:$0xff] }
  0x10   :  { %240 = vmatpush.bf16.msrb.mxu0 %v3395_v38  ;;  %3401 = vmatmul.msk.bf16.vlgmr.msra.gmra.mxu1 %vm175_vm0, %v4402_v41  ;;  %v4491_v63 = vld [vmem:[%s5993_s3 + $0xb0] sm:$0xff]  ;;  %v4473_v1 = vld [vmem:[%s5993_s3 + $0x20] sm:$0xff]  ;;  %v4490_v3 = vld [vmem:[%s5993_s3 + $0xa8] sm:$0xff] }
  0x11   :  { %254 = vmatpush.bf16.msrb.mxu1 %v3399_v42  ;;  %3402 = vmatmul.msk.bf16.vlgmr.msra.gmra.mxu2 %vm175_vm0, %v4402_v41  ;;  %v4499_v0 = vld [vmem:[%s5993_s3 + $0xf0] sm:$0xff]  ;;  %v4481_v2 = vld [vmem:[%s5993_s3 + $0x60] sm:$0xff]  ;;  %v4498_v4 = vld [vmem:[%s5993_s3 + $0xe8] sm:$0xff] }
  0x12   :  { %3403 = vmatmul.msk.bf16.vlgmr.msra.gmra.mxu3 %vm175_vm0, %v4402_v41  ;;  %751 = vmatpush.bf16.msrb.mxu2 %v4476_v47  ;;  %v4472_v5 = vld [vmem:[%s5993_s3 + $0x18] sm:$0xff] }
  0x13   :  { %765 = vmatpush.bf16.msrb.mxu3 %v4484_v49  ;;  %v4480_v6 = vld [vmem:[%s5993_s3 + $0x58] sm:$0xff] }
  0x14   :  { %241 = vmatpush.bf16.msrb.mxu0 %v3371_v48 }
  0x15   :  { %255 = vmatpush.bf16.msrb.mxu1 %v3375_v50 }
  0x16   :  { %752 = vmatpush.bf16.msrb.mxu2 %v4475_v55 }
  0x17   :  { %766 = vmatpush.bf16.msrb.mxu3 %v4483_v57 }
  0x18   :  { %242 = vmatpush.bf16.msrb.mxu0 %v3347_v56 }
  0x19   :  { %256 = vmatpush.bf16.msrb.mxu1 %v3351_v58 }
  0x1a   :  { %753 = vmatpush.bf16.msrb.mxu2 %v4474_v61 }
  0x1b   :  { %767 = vmatpush.bf16.msrb.mxu3 %v4482_v62 }
  0x1c   :  { %779 = vmatpush.bf16.msra.mxu0 %v4492_v59 }
  0x1d   :  { %793 = vmatpush.bf16.msra.mxu1 %v4500_v60 }
  0x1e   :  { %754 = vmatpush.bf16.msrb.mxu2 %v4473_v1 }
  0x1f   :  { %768 = vmatpush.bf16.msrb.mxu3 %v4481_v2 }
  0x20   :  { %780 = vmatpush.bf16.msra.mxu0 %v4491_v63 }
  0x21   :  { %794 = vmatpush.bf16.msra.mxu1 %v4499_v0 }
  0x22   :  { %18 = vsyncpa [#allocation3], 0  ;;  %3404 = vmatmul.msk.bf16.vlgmr.msrb.gmra.mxu0 %vm175_vm0, %v4402_v41  ;;  %3405 = vmatmul.msk.bf16.vlgmr.msrb.gmra.mxu1 %vm175_vm0, %v4402_v41  ;;  %v4489_v7 = vld [vmem:[%s5993_s3 + $0xa0] sm:$0xff]  ;;  %v4471_v9 = vld [vmem:[%s5993_s3 + $0x10] sm:$0xff]  ;;  %vm2052_vm7 = vcmask 523264   ;;  %vm2166_vm8 = vcmask 1043456  }
  0x23   :  { %755 = vmatpush.bf16.msrb.mxu2 %v4472_v5  ;;  %v4497_v8 = vld [vmem:[%s5993_s3 + $0xe0] sm:$0xff]  ;;  %769 = vmatpush.bf16.msrb.mxu3 %v4480_v6  ;;  %v4479_v10 = vld [vmem:[%s5993_s3 + $0x50] sm:$0xff]  ;;  %v4488_v11 = vld [vmem:[%s5993_s3 + $0x98] sm:$0xff]  ;;  %s4719_s23 = smov 56   ;;  %s4720_s24 = smov 64   ;;  %vm2093_vm9 = vcmask 64512  }
  0x24   :  { %781 = vmatpush.bf16.msra.mxu0 %v4490_v3  ;;  %v4496_v12 = vld [vmem:[%s5993_s3 + $0xd8] sm:$0xff]  ;;  %v4470_v13 = vld [vmem:[%s5993_s3 + $0x8] sm:$0xff]  ;;  %v4487_v15 = vld [vmem:[%s5993_s3 + $0x90] sm:$0xff]  ;;  %s4721_s25 = smov 112   ;;  %s4722_s26 = smov 48   ;;  %vm3143_vm11 = vcmask 1041409  }
  0x25   :  { %795 = vmatpush.bf16.msra.mxu1 %v4498_v4  ;;  %v4478_v14 = vld [vmem:[%s5993_s3 + $0x48] sm:$0xff]  ;;  %v4495_v16 = vld [vmem:[%s5993_s3 + $0xd0] sm:$0xff]  ;;  %v4469_v17 = vld [vmem:[%s5993_s3] sm:$0xff]  ;;  %s4724_s27 = smov 104   ;;  %s4725_s28 = smov 32   ;;  %vm3189_vm12 = vcmask 130048  }
  0x26   :  { %v4477_v18 = vld [vmem:[%s5993_s3 + $0x40] sm:$0xff]  ;;  %v4508_v19 = vld [vmem:[%s5993_s3 + $0x138] sm:$0xff]  ;;  %v4486_v21 = vld [vmem:[%s5993_s3 + $0x88] sm:$0xff]  ;;  %s4726_s29 = smov 88   ;;  %s4728_s30 = smov 24   ;;  %vm3191_vm13 = vcmask 195584  }
  0x27   :  { %756 = vmatpush.bf16.msrb.mxu2 %v4471_v9  ;;  %770 = vmatpush.bf16.msrb.mxu3 %v4479_v10  ;;  %v4516_v20 = vld [vmem:[%s5993_s3 + $0x178] sm:$0xff]  ;;  %v4494_v22 = vld [vmem:[%s5993_s3 + $0xc8] sm:$0xff]  ;;  %v4507_v23 = vld [vmem:[%s5993_s3 + $0x130] sm:$0xff]  ;;  %s4730_s14 = smov 80   ;;  %s4732_s15 = smov 72   ;;  %vm3193_vm14 = vcmask 261120  }
  0x28   :  { %782 = vmatpush.bf16.msra.mxu0 %v4489_v7  ;;  %v4515_v24 = vld [vmem:[%s5993_s3 + $0x170] sm:$0xff]  ;;  %v4485_v25 = vld [vmem:[%s5993_s3 + $0x80] sm:$0xff]  ;;  %v4524_v27 = vld [vmem:[%s5993_s3 + $0x338] sm:$0xff]  ;;  %vm3195_vm15 = vcmask 326656  }
  0x29   :  { %796 = vmatpush.bf16.msra.mxu1 %v4497_v8  ;;  %v4493_v26 = vld [vmem:[%s5993_s3 + $0xc0] sm:$0xff]  ;;  %v4532_v28 = vld [vmem:[%s5993_s3 + $0x378] sm:$0xff]  ;;  %v4506_v29 = vld [vmem:[%s5993_s3 + $0x128] sm:$0xff] }
  0x2a   :  { %v4514_v30 = vld [vmem:[%s5993_s3 + $0x168] sm:$0xff]  ;;  %v4523_v31 = vld [vmem:[%s5993_s3 + $0x330] sm:$0xff]  ;;  %v4505_v33 = vld [vmem:[%s5993_s3 + $0x120] sm:$0xff] }
  0x2b   :  { %757 = vmatpush.bf16.msrb.mxu2 %v4470_v13  ;;  %771 = vmatpush.bf16.msrb.mxu3 %v4478_v14  ;;  %v4531_v32 = vld [vmem:[%s5993_s3 + $0x370] sm:$0xff]  ;;  %v4513_v34 = vld [vmem:[%s5993_s3 + $0x160] sm:$0xff]  ;;  %v4522_v35 = vld [vmem:[%s5993_s3 + $0x328] sm:$0xff] }
  0x2c   :  { %783 = vmatpush.bf16.msra.mxu0 %v4488_v11  ;;  %v4530_v36 = vld [vmem:[%s5993_s3 + $0x368] sm:$0xff]  ;;  %v4504_v37 = vld [vmem:[%s5993_s3 + $0x118] sm:$0xff]  ;;  %v4521_v39 = vld [vmem:[%s5993_s3 + $0x320] sm:$0xff] }
  0x2d   :  { %797 = vmatpush.bf16.msra.mxu1 %v4496_v12  ;;  %v4512_v38 = vld [vmem:[%s5993_s3 + $0x158] sm:$0xff]  ;;  %v4529_v40 = vld [vmem:[%s5993_s3 + $0x360] sm:$0xff]  ;;  %v4503_v41 = vld [vmem:[%s5993_s3 + $0x110] sm:$0xff] }
  0x2e   :  { %v4511_v42 = vld [vmem:[%s5993_s3 + $0x150] sm:$0xff]  ;;  %v4520_v43 = vld [vmem:[%s5993_s3 + $0x318] sm:$0xff]  ;;  %v4502_v45 = vld [vmem:[%s5993_s3 + $0x108] sm:$0xff] }
  0x2f   :  { %758 = vmatpush.bf16.msrb.mxu2 %v4469_v17  ;;  %772 = vmatpush.bf16.msrb.mxu3 %v4477_v18  ;;  %v4528_v44 = vld [vmem:[%s5993_s3 + $0x358] sm:$0xff]  ;;  %v4510_v46 = vld [vmem:[%s5993_s3 + $0x148] sm:$0xff]  ;;  %v4519_v47 = vld [vmem:[%s5993_s3 + $0x310] sm:$0xff] }
  0x30   :  { %784 = vmatpush.bf16.msra.mxu0 %v4487_v15  ;;  %v4527_v48 = vld [vmem:[%s5993_s3 + $0x350] sm:$0xff]  ;;  %v4501_v49 = vld [vmem:[%s5993_s3 + $0x100] sm:$0xff]  ;;  %v4518_v51 = vld [vmem:[%s5993_s3 + $0x308] sm:$0xff] }
  0x31   :  { %798 = vmatpush.bf16.msra.mxu1 %v4495_v16  ;;  %v4509_v50 = vld [vmem:[%s5993_s3 + $0x140] sm:$0xff]  ;;  %v4526_v52 = vld [vmem:[%s5993_s3 + $0x348] sm:$0xff]  ;;  %v4540_v5 = vld [vmem:[%s5993_s3 + $0x3b8] sm:$0xff] }
  0x32   :  { %v4517_v53 = vld [vmem:[%s5993_s3 + $0x300] sm:$0xff]  ;;  %v4548_v8 = vld [vmem:[%s5993_s3 + $0x3f8] sm:$0xff]  ;;  %v4539_v11 = vld [vmem:[%s5993_s3 + $0x3b0] sm:$0xff] }
  0x33   :  { %807 = vmatpush.bf16.msra.mxu2 %v4508_v19  ;;  %821 = vmatpush.bf16.msra.mxu3 %v4516_v20  ;;  %v4525_v54 = vld [vmem:[%s5993_s3 + $0x340] sm:$0xff]  ;;  %v4547_v14 = vld [vmem:[%s5993_s3 + $0x3f0] sm:$0xff]  ;;  %v4556_v20 = vld [vmem:[%s5993_s3 + $0x438] sm:$0xff] }
  0x34   :  { %785 = vmatpush.bf16.msra.mxu0 %v4486_v21  ;;  %v66_v57 = vld [vmem:[%s5992_s2] sm:$0x3f]  ;;  %s4727_s2 = smov 96  }
  0x35   :  { %799 = vmatpush.bf16.msra.mxu1 %v4494_v22  ;;  %v68_v58 = vperm.slane %v66_v57, 0  ;;  %v69_v59 = vperm.slane %v66_v57, 1  ;;  %v70_v3 = vperm.slane %v66_v57, 2  ;;  %v71_v6 = vperm.slane %v66_v57, 3  ;;  %v4564_v22 = vld [vmem:[%s5993_s3 + $0x478] sm:$0xff] }
  0x37   :  { %808 = vmatpush.bf16.msra.mxu2 %v4507_v23  ;;  %822 = vmatpush.bf16.msra.mxu3 %v4515_v24  ;;  %v4538_v23 = vld [vmem:[%s5993_s3 + $0x3a8] sm:$0xff] }
  0x38   :  { %786 = vmatpush.bf16.msra.mxu0 %v4485_v25  ;;  %v72_v25 = vperm.slane %v66_v57, 4 }
  0x39   :  { %800 = vmatpush.bf16.msra.mxu1 %v4493_v26  ;;  %v4546_v26 = vld [vmem:[%s5993_s3 + $0x3e8] sm:$0xff] }
  0x3b   :  { %809 = vmatpush.bf16.msra.mxu2 %v4506_v29  ;;  %823 = vmatpush.bf16.msra.mxu3 %v4514_v30  ;;  %v4563_v29 = vld [vmem:[%s5993_s3 + $0x470] sm:$0xff]  ;;  %v4537_v30 = vld [vmem:[%s5993_s3 + $0x3a0] sm:$0xff] }
  0x3c   :  { %1220 = vmatpush.bf16.msrb.mxu0 %v4524_v27  ;;  %v73_v27 = vperm.slane %v66_v57, 5  ;;  %v4436_v57 = vld [vmem:[%s5993_s3 + $0x1f8] sm:$0xff] }
  0x3d   :  { %1234 = vmatpush.bf16.msrb.mxu1 %v4532_v28  ;;  %v4555_v28 = vld [vmem:[%s5993_s3 + $0x430] sm:$0xff] }
  0x3f   :  { %810 = vmatpush.bf16.msra.mxu2 %v4505_v33  ;;  %824 = vmatpush.bf16.msra.mxu3 %v4513_v34 }
  0x40   :  { %1221 = vmatpush.bf16.msrb.mxu0 %v4523_v31 }
  0x41   :  { %1235 = vmatpush.bf16.msrb.mxu1 %v4531_v32  ;;  %v4545_v32 = vld [vmem:[%s5993_s3 + $0x3e0] sm:$0xff] }
  0x43   :  { %811 = vmatpush.bf16.msra.mxu2 %v4504_v37  ;;  %825 = vmatpush.bf16.msra.mxu3 %v4512_v38  ;;  %v4554_v37 = vld [vmem:[%s5993_s3 + $0x428] sm:$0xff] }
  0x44   :  { %1222 = vmatpush.bf16.msrb.mxu0 %v4522_v35 }
  0x45   :  { %1236 = vmatpush.bf16.msrb.mxu1 %v4530_v36 }
  0x47   :  { %812 = vmatpush.bf16.msra.mxu2 %v4503_v41  ;;  %826 = vmatpush.bf16.msra.mxu3 %v4511_v42  ;;  %v4536_v41 = vld [vmem:[%s5993_s3 + $0x398] sm:$0xff] }
  0x48   :  { %1223 = vmatpush.bf16.msrb.mxu0 %v4521_v39  ;;  %v4562_v39 = vld [vmem:[%s5993_s3 + $0x468] sm:$0xff]  ;;  %v4544_v42 = vld [vmem:[%s5993_s3 + $0x3d8] sm:$0xff] }
  0x49   :  { %1237 = vmatpush.bf16.msrb.mxu1 %v4529_v40 }
  0x4b   :  { %813 = vmatpush.bf16.msra.mxu2 %v4502_v45  ;;  %827 = vmatpush.bf16.msra.mxu3 %v4510_v46  ;;  %v4561_v45 = vld [vmem:[%s5993_s3 + $0x460] sm:$0xff]  ;;  %v4535_v46 = vld [vmem:[%s5993_s3 + $0x390] sm:$0xff] }
  0x4c   :  { %1224 = vmatpush.bf16.msrb.mxu0 %v4520_v43 }
  0x4d   :  { %1238 = vmatpush.bf16.msrb.mxu1 %v4528_v44  ;;  %v4553_v44 = vld [vmem:[%s5993_s3 + $0x420] sm:$0xff] }
  0x4f   :  { %814 = vmatpush.bf16.msra.mxu2 %v4501_v49  ;;  %828 = vmatpush.bf16.msra.mxu3 %v4509_v50  ;;  %v4560_v49 = vld [vmem:[%s5993_s3 + $0x458] sm:$0xff]  ;;  %v4534_v50 = vld [vmem:[%s5993_s3 + $0x388] sm:$0xff] }
  0x50   :  { %1225 = vmatpush.bf16.msrb.mxu0 %v4519_v47  ;;  %v4543_v47 = vld [vmem:[%s5993_s3 + $0x3d0] sm:$0xff] }
  0x51   :  { %1239 = vmatpush.bf16.msrb.mxu1 %v4527_v48  ;;  %v4552_v48 = vld [vmem:[%s5993_s3 + $0x418] sm:$0xff] }
  0x54   :  { %1226 = vmatpush.bf16.msrb.mxu0 %v4518_v51  ;;  %v4542_v51 = vld [vmem:[%s5993_s3 + $0x3c8] sm:$0xff] }
  0x55   :  { %1240 = vmatpush.bf16.msrb.mxu1 %v4526_v52  ;;  %v4551_v52 = vld [vmem:[%s5993_s3 + $0x410] sm:$0xff] }
  0x58   :  { %1227 = vmatpush.bf16.msrb.mxu0 %v4517_v53  ;;  %v4559_v53 = vld [vmem:[%s5993_s3 + $0x450] sm:$0xff] }
  0x59   :  { %1241 = vmatpush.bf16.msrb.mxu1 %v4525_v54  ;;  %v4533_v54 = vld [vmem:[%s5993_s3 + $0x380] sm:$0xff] }
  0x8c   :  { %v188_v55 = vpop.f32.mrf.mxu0 }
  0x8d   :  { %v202_v56 = vpop.f32.mrf.mxu1  ;;  %v189_v63 = vadd.f32 %v188_v55, %v68_v58  ;;  %v4541_v55 = vld [vmem:[%s5993_s3 + $0x3c0] sm:$0xff] }
  0x8e   :  { %v203_v2 = vadd.f32 %v202_v56, %v69_v59  ;;  %v4428_v56 = vld [vmem:[%s5993_s3 + $0x1b8] sm:$0xff] }
  0x94   :  { %v216_v60 = vpop.f32.mrf.mxu2  ;;  %v190_v62 = vpop.f32.mrf.mxu0 }
  0x95   :  { %v230_v61 = vpop.f32.mrf.mxu3  ;;  %v191_v0 = vadd.f32 %v190_v62, %v68_v58  ;;  %v204_v1 = vpop.f32.mrf.mxu1  ;;  %v217_v10 = vadd.f32 %v216_v60, %v70_v3  ;;  %v4550_v58 = vld [vmem:[%s5993_s3 + $0x408] sm:$0xff]  ;;  %v4427_v60 = vld [vmem:[%s5993_s3 + $0x1b0] sm:$0xff]  ;;  %v4549_v62 = vld [vmem:[%s5993_s3 + $0x400] sm:$0xff] }
  0x96   :  { %v205_v4 = vadd.f32 %v204_v1, %v69_v59  ;;  %v231_v12 = vadd.f32 %v230_v61, %v71_v6  ;;  %v4558_v59 = vld [vmem:[%s5993_s3 + $0x448] sm:$0xff]  ;;  %v4435_v61 = vld [vmem:[%s5993_s3 + $0x1f0] sm:$0xff]  ;;  %v4452_v1 = vld [vmem:[%s5993_s3 + $0x278] sm:$0xff] }
  0x97   :  { %v5120_v7 = vpack.c.bf16 %v191_v0, %v189_v63  ;;  %v4557_v63 = vld [vmem:[%s5993_s3 + $0x440] sm:$0xff]  ;;  %v4444_v0 = vld [vmem:[%s5993_s3 + $0x238] sm:$0xff] }
  0x98   :  { %v5125_v9 = vpack.c.bf16 %v205_v4, %v203_v2  ;;  %v4426_v2 = vld [vmem:[%s5993_s3 + $0x1a8] sm:$0xff]  ;;  %v4443_v4 = vld [vmem:[%s5993_s3 + $0x230] sm:$0xff] }
  0x99   :  { %759 = vmatmul.bf16.vlgmr.msrb.gmra.mxu2 %v5120_v7 }
  0x9a   :  { %773 = vmatmul.bf16.vlgmr.msrb.gmra.mxu3 %v5125_v9  ;;  %1248 = vmatpush.bf16.msrb.mxu2 %v4540_v5  ;;  %v4451_v5 = vld [vmem:[%s5993_s3 + $0x270] sm:$0xff] }
  0x9b   :  { %1262 = vmatpush.bf16.msrb.mxu3 %v4548_v8  ;;  %v4433_v8 = vld [vmem:[%s5993_s3 + $0x1e0] sm:$0xff] }
  0x9c   :  { %v218_v13 = vpop.f32.mrf.mxu2 }
  0x9d   :  { %v219_v15 = vadd.f32 %v218_v13, %v70_v3  ;;  %v232_v16 = vpop.f32.mrf.mxu3  ;;  %v4434_v3 = vld [vmem:[%s5993_s3 + $0x1e8] sm:$0xff]  ;;  %v4432_v13 = vld [vmem:[%s5993_s3 + $0x1d8] sm:$0xff] }
  0x9e   :  { %v233_v18 = vadd.f32 %v232_v16, %v71_v6  ;;  %1249 = vmatpush.bf16.msrb.mxu2 %v4539_v11  ;;  %v4425_v6 = vld [vmem:[%s5993_s3 + $0x1a0] sm:$0xff]  ;;  %v4450_v11 = vld [vmem:[%s5993_s3 + $0x268] sm:$0xff]  ;;  %v4423_v16 = vld [vmem:[%s5993_s3 + $0x190] sm:$0xff] }
  0x9f   :  { %v244_v17 = vpop.f32.mrf.mxu0  ;;  %v258_v19 = vpop.f32.mrf.mxu1  ;;  %v5138_v21 = vpack.c.bf16 %v219_v15, %v217_v10  ;;  %1263 = vmatpush.bf16.msrb.mxu3 %v4547_v14  ;;  %v4442_v10 = vld [vmem:[%s5993_s3 + $0x228] sm:$0xff]  ;;  %v4441_v14 = vld [vmem:[%s5993_s3 + $0x220] sm:$0xff] }
  0xa0   :  { %v5146_v24 = vpack.c.bf16 %v233_v18, %v231_v12  ;;  %v245_v31 = vadd.f32 %v244_v17, %v72_v25  ;;  %v259_v33 = vadd.f32 %v258_v19, %v73_v27  ;;  %v4424_v12 = vld [vmem:[%s5993_s3 + $0x198] sm:$0xff]  ;;  %v4449_v15 = vld [vmem:[%s5993_s3 + $0x260] sm:$0xff]  ;;  %v4431_v17 = vld [vmem:[%s5993_s3 + $0x1d0] sm:$0xff] }
  0xa1   :  { %787 = vmatmul.bf16.vlgmr.msra.gmra.mxu0 %v5138_v21  ;;  %v4440_v18 = vld [vmem:[%s5993_s3 + $0x218] sm:$0xff] }
  0xa2   :  { %801 = vmatmul.bf16.vlgmr.msra.gmra.mxu1 %v5146_v24  ;;  %1276 = vmatpush.bf16.msra.mxu0 %v4556_v20  ;;  %v4448_v19 = vld [vmem:[%s5993_s3 + $0x258] sm:$0xff]  ;;  %v4422_v20 = vld [vmem:[%s5993_s3 + $0x188] sm:$0xff] }
  0xa3   :  { %1290 = vmatpush.bf16.msra.mxu1 %v4564_v22  ;;  %1250 = vmatpush.bf16.msrb.mxu2 %v4538_v23  ;;  %v4430_v22 = vld [vmem:[%s5993_s3 + $0x1c8] sm:$0xff]  ;;  %v4439_v23 = vld [vmem:[%s5993_s3 + $0x210] sm:$0xff] }
  0xa4   :  { %1264 = vmatpush.bf16.msrb.mxu3 %v4546_v26  ;;  %v4421_v26 = vld [vmem:[%s5993_s3 + $0x180] sm:$0xff] }
  0xa6   :  { %1277 = vmatpush.bf16.msra.mxu0 %v4555_v28  ;;  %v4460_v28 = vld [vmem:[%s5993_s3 + $0x2b8] sm:$0xff] }
  0xa7   :  { %v246_v34 = vpop.f32.mrf.mxu0  ;;  %v260_v36 = vpop.f32.mrf.mxu1  ;;  %1291 = vmatpush.bf16.msra.mxu1 %v4563_v29  ;;  %1251 = vmatpush.bf16.msrb.mxu2 %v4537_v30  ;;  %v4468_v29 = vld [vmem:[%s5993_s3 + $0x2f8] sm:$0xff]  ;;  %v4438_v30 = vld [vmem:[%s5993_s3 + $0x208] sm:$0xff] }
  0xa8   :  { %v247_v35 = vadd.f32 %v246_v34, %v72_v25  ;;  %v261_v38 = vadd.f32 %v260_v36, %v73_v27  ;;  %1265 = vmatpush.bf16.msrb.mxu3 %v4545_v32  ;;  %v4447_v25 = vld [vmem:[%s5993_s3 + $0x250] sm:$0xff]  ;;  %v4429_v27 = vld [vmem:[%s5993_s3 + $0x1c0] sm:$0xff]  ;;  %v4458_v36 = vld [vmem:[%s5993_s3 + $0x2a8] sm:$0xff] }
  0xa9   :  { %v4459_v32 = vld [vmem:[%s5993_s3 + $0x2b0] sm:$0xff]  ;;  %v4437_v34 = vld [vmem:[%s5993_s3 + $0x200] sm:$0xff] }
  0xaa   :  { %v5171_v40 = vpack.c.bf16 %v247_v35, %v245_v31  ;;  %v5179_v43 = vpack.c.bf16 %v261_v38, %v259_v33  ;;  %1278 = vmatpush.bf16.msra.mxu0 %v4554_v37  ;;  %v4446_v31 = vld [vmem:[%s5993_s3 + $0x248] sm:$0xff]  ;;  %v4467_v33 = vld [vmem:[%s5993_s3 + $0x2f0] sm:$0xff]  ;;  %v4445_v35 = vld [vmem:[%s5993_s3 + $0x240] sm:$0xff] }
  0xab   :  { %1292 = vmatpush.bf16.msra.mxu1 %v4562_v39  ;;  %1252 = vmatpush.bf16.msrb.mxu2 %v4536_v41  ;;  %v4466_v37 = vld [vmem:[%s5993_s3 + $0x2e8] sm:$0xff]  ;;  %v4456_v38 = vld [vmem:[%s5993_s3 + $0x298] sm:$0xff]  ;;  %v4463_v39 = vld [vmem:[%s5993_s3 + $0x2d0] sm:$0xff] }
  0xac   :  { %815 = vmatmul.bf16.vlgmr.msra.gmra.mxu2 %v5171_v40  ;;  %829 = vmatmul.bf16.vlgmr.msra.gmra.mxu3 %v5179_v43  ;;  %v4454_v41 = vld [vmem:[%s5993_s3 + $0x288] sm:$0xff] }
  0xad   :  { %1266 = vmatpush.bf16.msrb.mxu3 %v4544_v42  ;;  %v4462_v42 = vld [vmem:[%s5993_s3 + $0x2c8] sm:$0xff] }
  0xae   :  { %1279 = vmatpush.bf16.msra.mxu0 %v4553_v44  ;;  %v4453_v44 = vld [vmem:[%s5993_s3 + $0x280] sm:$0xff] }
  0xaf   :  { %1293 = vmatpush.bf16.msra.mxu1 %v4561_v45  ;;  %1253 = vmatpush.bf16.msrb.mxu2 %v4535_v46  ;;  %v4461_v45 = vld [vmem:[%s5993_s3 + $0x2c0] sm:$0xff] }
  0xb1   :  { %1267 = vmatpush.bf16.msrb.mxu3 %v4543_v47  ;;  %1228 = vmatmul.bf16.vlgmr.msrb.gmra.mxu0 %v5120_v7 }
  0xb2   :  { %1242 = vmatmul.bf16.vlgmr.msrb.gmra.mxu1 %v5125_v9  ;;  %1280 = vmatpush.bf16.msra.mxu0 %v4552_v48 }
  0xb3   :  { %1294 = vmatpush.bf16.msra.mxu1 %v4560_v49  ;;  %1254 = vmatpush.bf16.msrb.mxu2 %v4534_v50 }
  0xb5   :  { %1268 = vmatpush.bf16.msrb.mxu3 %v4542_v51 }
  0xb6   :  { %1281 = vmatpush.bf16.msra.mxu0 %v4551_v52 }
  0xb7   :  { %1295 = vmatpush.bf16.msra.mxu1 %v4559_v53  ;;  %1255 = vmatpush.bf16.msrb.mxu2 %v4533_v54 }
  0xb9   :  { %1269 = vmatpush.bf16.msrb.mxu3 %v4541_v55 }
  0xba   :  { %1282 = vmatpush.bf16.msra.mxu0 %v4550_v58  ;;  %v4580_v58 = vld [vmem:[%s5995_s5 + $0x38] sm:$0xff] }
  0xbb   :  { %1645 = vmatpush.bf16.msra.mxu2 %v4428_v56  ;;  %1296 = vmatpush.bf16.msra.mxu1 %v4558_v59 }
  0xbc   :  { %1256 = vmatmul.bf16.vlgmr.msrb.gmra.mxu2 %v5138_v21  ;;  %1270 = vmatmul.bf16.vlgmr.msrb.gmra.mxu3 %v5146_v24 }
  0xbd   :  { %1659 = vmatpush.bf16.msra.mxu3 %v4436_v57 }
  0xbe   :  { %1283 = vmatpush.bf16.msra.mxu0 %v4549_v62  ;;  %v4571_v62 = vld [vmem:[%s5995_s5 + $0x70] sm:$0xff] }
  0xbf   :  { %1646 = vmatpush.bf16.msra.mxu2 %v4427_v60  ;;  %1297 = vmatpush.bf16.msra.mxu1 %v4557_v63  ;;  %v4579_v60 = vld [vmem:[%s5995_s5 + $0x30] sm:$0xff] }
  0xc1   :  { %1660 = vmatpush.bf16.msra.mxu3 %v4435_v61  ;;  %1284 = vmatmul.bf16.vlgmr.msra.gmra.mxu0 %v5171_v40  ;;  %v4587_v61 = vld [vmem:[%s5995_s5 + $0xb0] sm:$0xff] }
  0xc2   :  { %1673 = vmatpush.bf16.msrb.mxu0 %v4444_v0  ;;  %1298 = vmatmul.bf16.vlgmr.msra.gmra.mxu1 %v5179_v43  ;;  %v4578_v0 = vld [vmem:[%s5995_s5 + $0x28] sm:$0xff] }
  0xc3   :  { %1687 = vmatpush.bf16.msrb.mxu1 %v4452_v1  ;;  %1647 = vmatpush.bf16.msra.mxu2 %v4426_v2  ;;  %v4586_v1 = vld [vmem:[%s5995_s5 + $0xa8] sm:$0xff] }
  0xc5   :  { %1661 = vmatpush.bf16.msra.mxu3 %v4434_v3  ;;  %v4570_v3 = vld [vmem:[%s5995_s5 + $0x68] sm:$0xff] }
  0xc6   :  { %1674 = vmatpush.bf16.msrb.mxu0 %v4443_v4 }
  0xc7   :  { %1688 = vmatpush.bf16.msrb.mxu1 %v4451_v5  ;;  %1648 = vmatpush.bf16.msra.mxu2 %v4425_v6 }
  0xc9   :  { %1662 = vmatpush.bf16.msra.mxu3 %v4433_v8 }
  0xca   :  { %1675 = vmatpush.bf16.msrb.mxu0 %v4442_v10 }
  0xcb   :  { %1689 = vmatpush.bf16.msrb.mxu1 %v4450_v11  ;;  %1649 = vmatpush.bf16.msra.mxu2 %v4424_v12 }
  0xcd   :  { %1663 = vmatpush.bf16.msra.mxu3 %v4432_v13 }
  0xce   :  { %1676 = vmatpush.bf16.msrb.mxu0 %v4441_v14  ;;  %v4577_v14 = vld [vmem:[%s5995_s5 + $0x20] sm:$0xff] }
  0xcf   :  { %1690 = vmatpush.bf16.msrb.mxu1 %v4449_v15  ;;  %1650 = vmatpush.bf16.msra.mxu2 %v4423_v16  ;;  %v4585_v15 = vld [vmem:[%s5995_s5 + $0xa0] sm:$0xff] }
  0xd0   :  { %v4569_v16 = vld [vmem:[%s5995_s5 + $0x60] sm:$0xff] }
  0xd1   :  { %1664 = vmatpush.bf16.msra.mxu3 %v4431_v17 }
  0xd2   :  { %1677 = vmatpush.bf16.msrb.mxu0 %v4440_v18 }
  0xd3   :  { %1691 = vmatpush.bf16.msrb.mxu1 %v4448_v19  ;;  %1651 = vmatpush.bf16.msra.mxu2 %v4422_v20  ;;  %v1304_v20 = vlaneseq }
  0xd5   :  { %1665 = vmatpush.bf16.msra.mxu3 %v4430_v22  ;;  %v4576_v22 = vld [vmem:[%s5995_s5 + $0x18] sm:$0xff] }
  0xd6   :  { %1678 = vmatpush.bf16.msrb.mxu0 %v4439_v23  ;;  %v4584_v23 = vld [vmem:[%s5995_s5 + $0x98] sm:$0xff] }
  0xd7   :  { %1692 = vmatpush.bf16.msrb.mxu1 %v4447_v25  ;;  %1652 = vmatpush.bf16.msra.mxu2 %v4421_v26 }
  0xd9   :  { %1666 = vmatpush.bf16.msra.mxu3 %v4429_v27  ;;  %v4568_v27 = vld [vmem:[%s5995_s5 + $0x58] sm:$0xff] }
  0xda   :  { %1679 = vmatpush.bf16.msrb.mxu0 %v4438_v30  ;;  %1653 = vmatmul.bf16.vlgmr.msra.gmra.mxu2 %v5120_v7  ;;  %v4457_v7 = vld [vmem:[%s5993_s3 + $0x2a0] sm:$0xff] }
  0xdb   :  { %1701 = vmatpush.bf16.msrb.mxu2 %v4460_v28  ;;  %1693 = vmatpush.bf16.msrb.mxu1 %v4446_v31  ;;  %v5438_v31 = vshrl.u32 %v1304_v20, 7 }
  0xdc   :  { %1667 = vmatmul.bf16.vlgmr.msra.gmra.mxu3 %v5125_v9  ;;  %v4465_v9 = vld [vmem:[%s5993_s3 + $0x2e0] sm:$0xff] }
  0xdd   :  { %1715 = vmatpush.bf16.msrb.mxu3 %v4468_v29  ;;  %vm1335_vm1 = vcmp.lt.s32.totalorder %v5438_v31, 1  ;;  %vm1348_vm4 = vcmp.lt.s32.totalorder %v5438_v31, 7 }
  0xde   :  { %1680 = vmatpush.bf16.msrb.mxu0 %v4437_v34  ;;  %v4567_v34 = vld [vmem:[%s5995_s5 + $0x50] sm:$0xff] }
  0xdf   :  { %1702 = vmatpush.bf16.msrb.mxu2 %v4459_v32  ;;  %1694 = vmatpush.bf16.msrb.mxu1 %v4445_v35  ;;  %v4575_v32 = vld [vmem:[%s5995_s5 + $0x10] sm:$0xff] }
  0xe1   :  { %1716 = vmatpush.bf16.msrb.mxu3 %v4467_v33  ;;  %1681 = vmatmul.bf16.vlgmr.msrb.gmra.mxu0 %v5138_v21  ;;  %v4464_v21 = vld [vmem:[%s5993_s3 + $0x2d8] sm:$0xff]  ;;  %v4583_v33 = vld [vmem:[%s5995_s5 + $0x90] sm:$0xff] }
  0xe2   :  { %1695 = vmatmul.bf16.vlgmr.msrb.gmra.mxu1 %v5146_v24  ;;  %v4455_v24 = vld [vmem:[%s5993_s3 + $0x290] sm:$0xff]  ;;  %1821 = vmatpush.bf16.msra.mxu0 %v4580_v58  ;;  %s4723_s3 = smov 40  }
  0xe3   :  { %1703 = vmatpush.bf16.msrb.mxu2 %v4458_v36 }
  0xe5   :  { %1717 = vmatpush.bf16.msrb.mxu3 %v4466_v37  ;;  %v1311_v37 = vand.u32 7, %v5438_v31 }
  0xe6   :  { %1822 = vmatpush.bf16.msra.mxu0 %v4579_v60 }
  0xe7   :  { %1704 = vmatpush.bf16.msrb.mxu2 %v4457_v7  ;;  %vm5460_vm2 = vcmp.eq.s32.totalorder %v1311_v37, 0  ;;  %vm5490_vm5 = vcmp.eq.s32.totalorder %v1311_v37, 7 }
  0xe9   :  { %1718 = vmatpush.bf16.msrb.mxu3 %v4465_v9  ;;  %v4574_v9 = vld [vmem:[%s5995_s5 + $0x8] sm:$0xff] }
  0xea   :  { %1823 = vmatpush.bf16.msra.mxu0 %v4578_v0 }
  0xeb   :  { %1705 = vmatpush.bf16.msrb.mxu2 %v4456_v38  ;;  %v4582_v38 = vld [vmem:[%s5995_s5 + $0x88] sm:$0xff] }
  0xed   :  { %1719 = vmatpush.bf16.msrb.mxu3 %v4464_v21  ;;  %v4566_v21 = vld [vmem:[%s5995_s5 + $0x48] sm:$0xff] }
  0xee   :  { %1824 = vmatpush.bf16.msra.mxu0 %v4577_v14 }
  0xef   :  { %1706 = vmatpush.bf16.msrb.mxu2 %v4455_v24 }
  0xf1   :  { %1720 = vmatpush.bf16.msrb.mxu3 %v4463_v39 }
  0xf2   :  { %1825 = vmatpush.bf16.msra.mxu0 %v4576_v22 }
  0xf3   :  { %1707 = vmatpush.bf16.msrb.mxu2 %v4454_v41 }
  0xf5   :  { %1721 = vmatpush.bf16.msrb.mxu3 %v4462_v42 }
  0xf6   :  { %1826 = vmatpush.bf16.msra.mxu0 %v4575_v32 }
  0xf7   :  { %1708 = vmatpush.bf16.msrb.mxu2 %v4453_v44 }
  0xf9   :  { %1722 = vmatpush.bf16.msrb.mxu3 %v4461_v45  ;;  %v1306_v45 = vadd.s32 8, %v5438_v31 }
  0xfa   :  { %1709 = vmatmul.bf16.vlgmr.msrb.gmra.mxu2 %v5171_v40  ;;  %v4588_v40 = vld [vmem:[%s5995_s5 + $0xb8] sm:$0xff]  ;;  %1827 = vmatpush.bf16.msra.mxu0 %v4574_v9 }
  0xfb   :  { %1900 = vmatpush.bf16.msra.mxu1 %v4588_v40 }
  0xfc   :  { %1723 = vmatmul.bf16.vlgmr.msrb.gmra.mxu3 %v5179_v43  ;;  %v4572_v43 = vld [vmem:[%s5995_s5 + $0x78] sm:$0xff] }
  0xfd   :  { %1974 = vmatpush.bf16.msra.mxu2 %v4572_v43  ;;  %v2006_v43 = vld [vmem:[%s5998_s8] sm:$0x3]  ;;  %s4718_s8 = smov 120  }
  0xff   :  { %1901 = vmatpush.bf16.msra.mxu1 %v4587_v61 }
 0x101   :  { %1975 = vmatpush.bf16.msra.mxu2 %v4571_v62 }
 0x103   :  { %1902 = vmatpush.bf16.msra.mxu1 %v4586_v1 }
 0x105   :  { %1976 = vmatpush.bf16.msra.mxu2 %v4570_v3 }
 0x107   :  { %1903 = vmatpush.bf16.msra.mxu1 %v4585_v15 }
 0x109   :  { %1977 = vmatpush.bf16.msra.mxu2 %v4569_v16 }
 0x10b   :  { %1904 = vmatpush.bf16.msra.mxu1 %v4584_v23 }
 0x10d   :  { %1978 = vmatpush.bf16.msra.mxu2 %v4568_v27 }
 0x10f   :  { %1905 = vmatpush.bf16.msra.mxu1 %v4583_v33 }
 0x111   :  { %1979 = vmatpush.bf16.msra.mxu2 %v4567_v34 }
 0x113   :  { %1906 = vmatpush.bf16.msra.mxu1 %v4582_v38 }
 0x115   :  { %1980 = vmatpush.bf16.msra.mxu2 %v4566_v21 }
 0x11c   :  { %v760_v46 = vpop.f32.mrf.mxu2 }
 0x11d   :  { %v774_v47 = vpop.f32.mrf.mxu3 }
 0x11e   :  { %v788_v48 = vpop.f32.mrf.mxu0  ;;  %v775_v4 = vadd.f32 %v774_v47, %v760_v46 }
 0x11f   :  { %v802_v51 = vpop.f32.mrf.mxu1 }
 0x120   :  { %v789_v11 = vadd.f32 %v788_v48, %v775_v4 }
 0x122   :  { %v803_v17 = vadd.f32 %v802_v51, %v789_v11  ;;  %v4565_v51 = vld [vmem:[%s5995_s5 + $0x40] sm:$0xff] }
 0x123   :  { %1981 = vmatpush.bf16.msra.mxu2 %v4565_v51  ;;  %v4322_v51 = vld [vmem:[%s5997_s7 + $0x28] sm:$0xf0] }
 0x124   :  { %v762_v49 = vpop.f32.mrf.mxu2 }
 0x125   :  { %v776_v50 = vpop.f32.mrf.mxu3 }
 0x126   :  { %v790_v52 = vpop.f32.mrf.mxu0  ;;  %v777_v2 = vadd.f32 %v776_v50, %v762_v49  ;;  %v4573_v49 = vld [vmem:[%s5995_s5] sm:$0xff] }
 0x127   :  { %v804_v55 = vpop.f32.mrf.mxu1  ;;  %v4581_v50 = vld [vmem:[%s5995_s5 + $0x80] sm:$0xff]  ;;  %1828 = vmatpush.bf16.msra.mxu0 %v4573_v49  ;;  %s4729_s5 = smov 16  }
 0x128   :  { %v791_v8 = vadd.f32 %v790_v52, %v777_v2  ;;  %1907 = vmatpush.bf16.msra.mxu1 %v4581_v50  ;;  %v4593_v49 = vld [vmem:[%s5997_s7 + $0x24] sm:$0xf] }
 0x12a   :  { %v805_v13 = vadd.f32 %v804_v55, %v791_v8  ;;  %v1318_v55 = vand.u32 7, %v1306_v45  ;;  %v4330_v45 = vld [vmem:[%s5997_s7 + $0x38] sm:$0xf0] }
 0x12c   :  { %vm5481_vm3 = vcmp.eq.s32.totalorder %v1318_v55, 0  ;;  %vm5501_vm6 = vcmp.eq.s32.totalorder %v1318_v55, 7 }
 0x12e   :  { %v5387_v56 = vpop.f32.mrf.mxu0 }
 0x12f   :  { %v816_v53 = vpop.f32.mrf.mxu2  ;;  %v830_v54 = vpop.f32.mrf.mxu3 }
 0x130   :  { %v5407_v63 = vpop.f32.mrf.mxu1  ;;  %v817_v19 = vadd.f32 %v816_v53, %v803_v17 }
 0x131   :  { %v1244_v47 = vadd.f32 %v5407_v63, %v5387_v56 }
 0x132   :  { %v831_v30 = vadd.f32 %v830_v54, %v817_v19 }
 0x134   :  { %v1333_v7 = vrot.slane %v831_v30, 7 }
 0x136   :  { %v1231_v5 = vpop.f32.mrf.mxu0 }
 0x137   :  { %v818_v57 = vpop.f32.mrf.mxu2  ;;  %v832_v59 = vpop.f32.mrf.mxu3 }
 0x138   :  { %v1245_v12 = vpop.f32.mrf.mxu1  ;;  %v819_v18 = vadd.f32 %v818_v57, %v805_v13 }
 0x139   :  { %v1246_v39 = vadd.f32 %v1245_v12, %v1231_v5 }
 0x13a   :  { %v833_v28 = vadd.f32 %v832_v59, %v819_v18 }
 0x13c   :  { %v1334_v36 = vrot.slane %v833_v28, 7  ;;  %v4622_v28 = vld [vmem:[%s5994_s4] ss:$0 sm:$0xff]  ;;  %s4731_s4 = smov 8  }
 0x13e   :  { %v1285_v25 = vpop.f32.mrf.mxu0  ;;  %v1337_v42 = vsel %vm1335_vm1, %v1334_v36, %v1333_v7  ;;  %v1336_v59 = vsel %vm1335_vm1, %v1333_v7, %v1334_v36 }
 0x13f   :  { %v1257_v6 = vpop.f32.mrf.mxu2  ;;  %v5418_v10 = vpop.f32.mrf.mxu3  ;;  %v1342_v52 = vsel %vm5460_vm2, 0.0, %v1337_v42  ;;  %v1343_v0 = vsel %vm5481_vm3, 0.0, %v1336_v59  ;;  %v4595_v42 = vld [vmem:[%s5997_s7 + $0x34] sm:$0xf]  ;;  %v4590_v59 = vld [vmem:[%s5997_s7 + $0x4] sm:$0xf0] }
 0x140   :  { %v1299_v35 = vpop.f32.mrf.mxu1  ;;  %v1258_v53 = vadd.f32 %v1257_v6, %v1244_v47  ;;  %v4320_v47 = vld [vmem:[%s5997_s7 + $0x20] sm:$0xf] }
 0x142   :  { %v1272_v58 = vadd.f32 %v5418_v10, %v1258_v53  ;;  %v4312_v53 = vld [vmem:[%s5997_s7 + $0x10] sm:$0xf] }
 0x144   :  { %v1286_v1 = vadd.f32 %v1285_v25, %v1272_v58 }
 0x146   :  { %v1287_v46 = vpop.f32.mrf.mxu0  ;;  %v1300_v6 = vadd.f32 %v1299_v35, %v1286_v1 }
 0x147   :  { %v1259_v26 = vpop.f32.mrf.mxu2  ;;  %v1273_v29 = vpop.f32.mrf.mxu3 }
 0x148   :  { %v1260_v48 = vadd.f32 %v1259_v26, %v1246_v39  ;;  %v1301_v56 = vpop.f32.mrf.mxu1  ;;  %v1346_v16 = vrot.slane %v1300_v6, 1  ;;  %v4596_v39 = vld [vmem:[%s5997_s7 + $0x34] sm:$0xf0] }
 0x14a   :  { %v1274_v57 = vadd.f32 %v1273_v29, %v1260_v48  ;;  %v4594_v48 = vld [vmem:[%s5997_s7 + $0x24] sm:$0xf0] }
 0x14b   :  { %v4321_v50 = vor.u32 %v4594_v48, %v4320_v47 }
 0x14c   :  { %v1288_v62 = vadd.f32 %v1287_v46, %v1274_v57  ;;  %v4333_v46 = vor.u32 %v4595_v42, %v4330_v45  ;;  %v4314_v57 = vld [vmem:[%s5997_s7 + $0x18] sm:$0xf0] }
 0x14e   :  { %v1302_v5 = vadd.f32 %v1301_v56, %v1288_v62  ;;  %2074 = vmatpush.bf16.msrb.mxu0 %v4333_v46  ;;  %v4591_v56 = vld [vmem:[%s5997_s7 + $0x14] sm:$0xf]  ;;  %v4306_v62 = vld [vmem:[%s5997_s7 + $0x8] sm:$0xf0] }
 0x14f   :  { %v4317_v58 = vor.u32 %v4591_v56, %v4314_v57 }
 0x150   :  { %v1347_v12 = vrot.slane %v1302_v5, 1 }
 0x152   :  { %v1349_v19 = vsel %vm1348_vm4, %v1346_v16, %v1347_v12  ;;  %v1350_v32 = vsel %vm1348_vm4, %v1347_v12, %v1346_v16 }
 0x153   :  { %v1355_v25 = vsel %vm5490_vm5, 0.0, %v1349_v19  ;;  %v1356_v35 = vsel %vm5501_vm6, 0.0, %v1350_v32  ;;  %v4623_v19 = vld [vmem:[%s5996_s6] ss:$0 sm:$0xff]  ;;  %v2009_v32 = vperm.slane %v2006_v43, 1 }
 0x15d   :  { %v1654_v24 = vpop.f32.mrf.mxu2 }
 0x15e   :  { %v1655_v54 = vadd.f32 %v1654_v24, %v1342_v52  ;;  %v1682_v60 = vpop.f32.mrf.mxu0  ;;  %v4328_v24 = vld [vmem:[%s5997_s7 + $0x30] sm:$0xf]  ;;  %v4325_v52 = vor.u32 %v4593_v49, %v4322_v51 }
 0x15f   :  { %v1668_v44 = vpop.f32.mrf.mxu3  ;;  %v1696_v4 = vpop.f32.mrf.mxu1 }
 0x160   :  { %v1669_v40 = vadd.f32 %v1668_v44, %v1655_v54  ;;  %v4329_v44 = vor.u32 %v4596_v39, %v4328_v24  ;;  %2075 = vmatpush.bf16.msrb.mxu0 %v4325_v52  ;;  %v4592_v54 = vld [vmem:[%s5997_s7 + $0x14] sm:$0xf0] }
 0x161   :  { %v4313_v55 = vor.u32 %v4592_v54, %v4312_v53 }
 0x162   :  { %v1683_v2 = vadd.f32 %v1682_v60, %v1669_v40  ;;  %2060 = vmatpush.bf16.msra.mxu3 %v4329_v44  ;;  %v4304_v40 = vld [vmem:[%s5997_s7] sm:$0xf]  ;;  %v4589_v60 = vld [vmem:[%s5997_s7 + $0x4] sm:$0xf] }
 0x164   :  { %v1697_v8 = vadd.f32 %v1696_v4, %v1683_v2  ;;  %2076 = vmatpush.bf16.msrb.mxu0 %v4317_v58 }
 0x165   :  { %v1656_v61 = vpop.f32.mrf.mxu2 }
 0x166   :  { %v1657_v3 = vadd.f32 %v1656_v61, %v1343_v0  ;;  %v1684_v15 = vpop.f32.mrf.mxu0  ;;  %2061 = vmatpush.bf16.msra.mxu3 %v4321_v50  ;;  %v4305_v61 = vor.u32 %v4590_v59, %v4304_v40 }
 0x167   :  { %v1670_v63 = vpop.f32.mrf.mxu3  ;;  %v1698_v22 = vpop.f32.mrf.mxu1 }
 0x168   :  { %v1671_v10 = vadd.f32 %v1670_v63, %v1657_v3  ;;  %v4309_v63 = vor.u32 %v4589_v60, %v4306_v62 }
 0x16a   :  { %v1685_v17 = vadd.f32 %v1684_v15, %v1671_v10  ;;  %2062 = vmatpush.bf16.msra.mxu3 %v4313_v55  ;;  %2077 = vmatpush.bf16.msrb.mxu0 %v4309_v63 }
 0x16c   :  { %v1699_v23 = vadd.f32 %v1698_v22, %v1685_v17 }
 0x16e   :  { %2063 = vmatpush.bf16.msra.mxu3 %v4305_v61 }
 0x17d   :  { %v1710_v11 = vpop.f32.mrf.mxu2 }
 0x17e   :  { %v1711_v13 = vadd.f32 %v1710_v11, %v1697_v8 }
 0x17f   :  { %v1724_v14 = vpop.f32.mrf.mxu3 }
 0x180   :  { %v1725_v20 = vadd.f32 %v1724_v14, %v1711_v13 }
 0x182   :  { %v1729_v27 = vadd.f32 %v1725_v20, %v1355_v25 }
 0x184   :  { %v1734_v36 = vadd.f32 %v4622_v28, %v1729_v27 }
 0x185   :  { %v1712_v26 = vpop.f32.mrf.mxu2 }
 0x186   :  { %v1713_v29 = vadd.f32 %v1712_v26, %v1699_v23  ;;  %v1736_v9 = vmax.f32 %v1734_v36, 0.0 }
 0x187   :  { %v1726_v33 = vpop.f32.mrf.mxu3 }
 0x188   :  { %v1727_v34 = vadd.f32 %v1726_v33, %v1713_v29 }
 0x18a   :  { %v1730_v37 = vadd.f32 %v1727_v34, %v1356_v35  ;;  %v2008_v35 = vperm.slane %v2006_v43, 0 }
 0x18c   :  { %v1735_v7 = vadd.f32 %v4622_v28, %v1730_v37 }
 0x18e   :  { %v1737_v38 = vmax.f32 %v1735_v7, 0.0 }
 0x190   :  { %v1738_v21 = vpack.c.bf16 %v1737_v38, %v1736_v9 }
 0x192   :  { %1829 = vmatmul.bf16.vlgmr.msra.gmra.mxu0 %v1738_v21  ;;  %1908 = vmatmul.bf16.vlgmr.msra.gmra.mxu1 %v1738_v21 }
 0x193   :  { %1982 = vmatmul.bf16.vlgmr.msra.gmra.mxu2 %v1738_v21 }
 0x20f   :  { %v1830_v0 = vpop.f32.mrf.mxu0  ;;  %v1909_v1 = vpop.f32.mrf.mxu1 }
 0x210   :  { %v1914_v5 = vrot.slane %v1830_v0, 7  ;;  %v1920_v6 = vrot.slane %v1909_v1, 1 }
 0x216   :  { %v1983_v2 = vpop.f32.mrf.mxu2 }
 0x217   :  { %v1832_v3 = vpop.f32.mrf.mxu0  ;;  %v1911_v4 = vpop.f32.mrf.mxu1 }
 0x218   :  { %v1915_v8 = vrot.slane %v1832_v3, 7  ;;  %v1921_v10 = vrot.slane %v1911_v4, 1 }
 0x21a   :  { %v1917_v11 = vsel %vm1335_vm1, %v1915_v8, %v1914_v5  ;;  %v1922_v12 = vsel %vm1348_vm4, %v1920_v6, %v1921_v10  ;;  %v1916_v14 = vsel %vm1335_vm1, %v1914_v5, %v1915_v8  ;;  %v1923_v17 = vsel %vm1348_vm4, %v1921_v10, %v1920_v6 }
 0x21b   :  { %v1918_v13 = vsel %vm5460_vm2, 0.0, %v1917_v11  ;;  %v1924_v16 = vsel %vm5490_vm5, 0.0, %v1922_v12  ;;  %v1919_v22 = vsel %vm5481_vm3, 0.0, %v1916_v14  ;;  %v1925_v25 = vsel %vm5501_vm6, 0.0, %v1923_v17 }
 0x21c   :  { %v1984_v15 = vadd.f32 %v1983_v2, %v1918_v13  ;;  %vm3198_vm1 = vcmask 457728  }
 0x21e   :  { %v1988_v20 = vadd.f32 %v1984_v15, %v1924_v16  ;;  %v1985_v41 = vpop.f32.mrf.mxu2 }
 0x21f   :  { %v1986_v23 = vadd.f32 %v1985_v41, %v1919_v22 }
 0x220   :  { %v1993_v27 = vadd.f32 %v4623_v19, %v1988_v20 }
 0x221   :  { %v1989_v26 = vadd.f32 %v1986_v23, %v1925_v25 }
 0x222   :  { %v1995_v28 = vmax.f32 %v1993_v27, 0.0 }
 0x223   :  { %v1994_v18 = vadd.f32 %v4623_v19, %v1989_v26 }
 0x225   :  { %v1996_v29 = vmax.f32 %v1994_v18, 0.0 }
 0x227   :  { %v1997_v31 = vpack.c.bf16 %v1996_v29, %v1995_v28 }
 0x229   :  { %4334 = vmatmul.msk.bf16.vlgmr.msra.gmra.mxu3 %vm2052_vm7, %v1997_v31  ;;  %4335 = vmatmul.msk.bf16.vlgmr.msrb.gmra.mxu0 %vm2052_vm7, %v1997_v31 }
 0x2a6   :  { %v2079_v33 = vpop.f32.mrf.mxu0 }
 0x2a7   :  { %v2080_v34 = vadd.f32 %v2079_v33, %v2009_v32 }
 0x2a9   :  { %v5581_v30 = vpack.c.bf16 %v2080_v34, %v2080_v34 }
 0x2ab   :  { %v2168_v36 = vsel %vm2166_vm8, %v5581_v30, 0  ;;  %v2298_v51 = vunpack.c.l.b16 %v5581_v30 }
 0x2ac   :  { %v2065_v37 = vpop.f32.mrf.mxu3  ;;  %2177 = vmatpush.bf16.msra.mxu0 %v2168_v36 }
 0x2ad   :  { %v2066_v7 = vadd.f32 %v2065_v37, %v2008_v35  ;;  %v5620_v52 = vpack.c.b16 %v2298_v51, %v2298_v51 }
 0x2ae   :  { %v2081_v46 = vpop.f32.mrf.mxu0 }
 0x2af   :  { %v5585_v9 = vpack.c.bf16 %v2066_v7, %v2066_v7  ;;  %v2082_v47 = vadd.f32 %v2081_v46, %v2009_v32 }
 0x2b1   :  { %v2089_v38 = vunpack.c.l.b16 %v5585_v9  ;;  %v2087_v48 = vpack.c.bf16 %v2082_v47, %v2082_v47 }
 0x2b3   :  { %v2090_v21 = vpack.c.b16 %v2089_v38, %v2089_v38  ;;  %v2322_v49 = vunpack.c.l.b16 %v2087_v48  ;;  %v2187_v60 = vsel %vm2166_vm8, %v2087_v48, 0 }
 0x2b4   :  { %v2067_v24 = vpop.f32.mrf.mxu3 }
 0x2b5   :  { %v2068_v39 = vadd.f32 %v2067_v24, %v2008_v35  ;;  %2225 = vrot.lane.b32.xlu2 %v2090_v21, %s4718_s8  ;;  %2227 = vrot.lane.b32.xlu1 %v2090_v21, %s4719_s23  ;;  %v5613_v50 = vpack.c.b16 %v2322_v49, %v2322_v49 }
 0x2b6   :  { %2091 = vrot.lane.b32.xlu0 %v2090_v21, %s4720_s24 }
 0x2b7   :  { %v5590_v42 = vpack.c.bf16 %v2068_v39, %v2068_v39 }
 0x2b9   :  { %v2114_v44 = vunpack.c.l.b16 %v5590_v42 }
 0x2bb   :  { %v2115_v45 = vpack.c.b16 %v2114_v44, %v2114_v44 }
 0x2bd   :  { %2248 = vrot.lane.b32.xlu2 %v2115_v45, %s4718_s8  ;;  %2250 = vrot.lane.b32.xlu1 %v2115_v45, %s4719_s23 }
 0x2be   :  { %2116 = vrot.lane.b32.xlu0 %v2115_v45, %s4720_s24 }
 0x2c5   :  { %2361 = vrot.lane.b32.xlu2 %v2090_v21, %s4721_s25  ;;  %2386 = vrot.lane.b32.xlu1 %v2115_v45, %s4722_s26 }
 0x2c6   :  { %2363 = vrot.lane.b32.xlu0 %v2090_v21, %s4722_s26 }
 0x2cd   :  { %2516 = vrot.lane.b32.xlu2 %v2115_v45, %s4723_s3  ;;  %2493 = vrot.lane.b32.xlu1 %v2090_v21, %s4723_s3 }
 0x2ce   :  { %2491 = vrot.lane.b32.xlu0 %v2090_v21, %s4724_s27 }
 0x2d5   :  { %2623 = vrot.lane.b32.xlu2 %v2090_v21, %s4725_s28  ;;  %2514 = vrot.lane.b32.xlu1 %v2115_v45, %s4724_s27 }
 0x2d6   :  { %2384 = vrot.lane.b32.xlu0 %v2115_v45, %s4721_s25 }
 0x2dd   :  { %2751 = vrot.lane.b32.xlu2 %v2090_v21, %s4726_s29  ;;  %2621 = vrot.lane.b32.xlu1 %v2090_v21, %s4727_s2 }
 0x2de   :  { %2753 = vrot.lane.b32.xlu0 %v2090_v21, %s4728_s30 }
 0x2e5   :  { %2644 = vrot.lane.b32.xlu2 %v2115_v45, %s4727_s2  ;;  %2883 = vrot.lane.b32.xlu1 %v2090_v21, %s4729_s5 }
 0x2e6   :  { %2881 = vrot.lane.b32.xlu0 %v2090_v21, %s4730_s14 }
 0x2ed   :  { %3013 = vrot.lane.b32.xlu2 %v2090_v21, %s4731_s4  ;;  %2776 = vrot.lane.b32.xlu1 %v2115_v45, %s4728_s30 }
 0x2ee   :  { %2646 = vrot.lane.b32.xlu0 %v2115_v45, %s4725_s28 }
 0x2f5   :  { %2324 = vrot.lane.b32.xlu2 %v5613_v50, %s4718_s8  ;;  %3011 = vrot.lane.b32.xlu1 %v2090_v21, %s4732_s15 }
 0x2f6   :  { %2774 = vrot.lane.b32.xlu0 %v2115_v45, %s4726_s29 }
 0x2fd   :  { %2906 = vrot.lane.b32.xlu2 %v2115_v45, %s4729_s5  ;;  %2300 = vrot.lane.b32.xlu1 %v5620_v52, %s4718_s8 }
 0x2fe   :  { %2454 = vrot.lane.b32.xlu0 %v5613_v50, %s4721_s25 }
 0x305   :  { %2433 = vrot.lane.b32.xlu2 %v5620_v52, %s4721_s25  ;;  %2904 = vrot.lane.b32.xlu1 %v2115_v45, %s4730_s14 }
 0x306   :  { %3036 = vrot.lane.b32.xlu0 %v2115_v45, %s4731_s4 }
 0x30d   :  { %3034 = vrot.lane.b32.xlu2 %v2115_v45, %s4732_s15 }
 0x30f   :  { %v2226_v53 = vpop.permute.xlu2 %2225 }
 0x317   :  { %v2249_v54 = vpop.permute.xlu2 %2248 }
 0x31f   :  { %v2362_v55 = vpop.permute.xlu2 %2361 }
 0x327   :  { %v2517_v56 = vpop.permute.xlu2 %2516  ;;  %v2228_v57 = vpop.permute.xlu1 %2227 }
 0x328   :  { %v2233_v58 = vsel %vm2093_vm9, %v2228_v57, 0  ;;  %v2092_v40 = vpop.permute.xlu0 %2091  ;;  %v2522_v17 = vsel %vm2093_vm9, %v2517_v56, 0 }
 0x329   :  { %v2098_v59 = vsel %vm2093_vm9, %v2092_v40, 0  ;;  %2242 = vmatpush.bf16.xpose.msrb.mxu2 %v2233_v58 }
 0x32a   :  { %2107 = vmatpush.bf16.xpose.msrb.mxu1 %v2098_v59 }
 0x32f   :  { %v2624_v61 = vpop.permute.xlu2 %2623  ;;  %v2251_v62 = vpop.permute.xlu1 %2250 }
 0x330   :  { %v2256_v63 = vsel %vm2093_vm9, %v2251_v62, 0  ;;  %v2117_v0 = vpop.permute.xlu0 %2116  ;;  %4340 = vmatmul.msk.bf16.vlgmr.msrb.gmra.mxu2 %vm2093_vm9, %v2226_v53  ;;  %v2629_v13 = vsel %vm2093_vm9, %v2624_v61, 0 }
 0x331   :  { %v2122_v1 = vsel %vm2093_vm9, %v2117_v0, 0  ;;  %4336 = vmatmul.msk.bf16.vlgmr.msrb.gmra.mxu1 %vm2093_vm9, %v5585_v9 }
 0x332   :  { %2196 = vmatpush.bf16.msra.mxu1 %v2187_v60  ;;  %2131 = vmatpush.bf16.xpose.msrb.mxu3 %v2122_v1 }
 0x337   :  { %v2752_v2 = vpop.permute.xlu2 %2751  ;;  %v2387_v3 = vpop.permute.xlu1 %2386 }
 0x338   :  { %v2392_v4 = vsel %vm2093_vm9, %v2387_v3, 0  ;;  %v2364_v5 = vpop.permute.xlu0 %2363 }
 0x339   :  { %v2369_v6 = vsel %vm2093_vm9, %v2364_v5, 0  ;;  %4337 = vmatmul.msk.bf16.vlgmr.msrb.gmra.mxu3 %vm2093_vm9, %v5590_v42 }
 0x33a   :  { %2265 = vmatpush.bf16.xpose.msra.mxu3 %v2256_v63  ;;  %2378 = vmatpush.bf16.xpose.msra.mxu2 %v2369_v6 }
 0x33f   :  { %v2645_v8 = vpop.permute.xlu2 %2644  ;;  %v2494_v10 = vpop.permute.xlu1 %2493 }
 0x340   :  { %v2499_v11 = vsel %vm2093_vm9, %v2494_v10, 0  ;;  %v2492_v12 = vpop.permute.xlu0 %2491 }
 0x341   :  { %4344 = vmatmul.msk.bf16.vlgmr.msra.gmra.mxu2 %vm2093_vm9, %v2362_v55 }
 0x342   :  { %2401 = vmatpush.bf16.xpose.msrb.mxu3 %v2392_v4  ;;  %2508 = vmatpush.bf16.xpose.msrb.mxu2 %v2499_v11 }
 0x347   :  { %v3014_v14 = vpop.permute.xlu2 %3013  ;;  %v2515_v15 = vpop.permute.xlu1 %2514 }
 0x348   :  { %v2385_v16 = vpop.permute.xlu0 %2384  ;;  %v3019_v34 = vsel %vm2093_vm9, %v3014_v14, 0 }
 0x349   :  { %4341 = vmatmul.msk.bf16.vlgmr.msra.gmra.mxu3 %vm2093_vm9, %v2249_v54 }
 0x34a   :  { %2638 = vmatpush.bf16.xpose.msra.mxu2 %v2629_v13  ;;  %2531 = vmatpush.bf16.xpose.msra.mxu3 %v2522_v17 }
 0x34f   :  { %v2325_v19 = vpop.permute.xlu2 %2324  ;;  %v2622_v20 = vpop.permute.xlu1 %2621 }
 0x350   :  { %v2330_v22 = vsel %vm2166_vm8, %v2325_v19, 0  ;;  %v2754_v41 = vpop.permute.xlu0 %2753 }
 0x351   :  { %v2759_v23 = vsel %vm2093_vm9, %v2754_v41, 0  ;;  %4348 = vmatmul.msk.bf16.vlgmr.msrb.gmra.mxu2 %vm2093_vm9, %v2492_v12  ;;  %2339 = vmatpush.bf16.msrb.mxu1 %v2330_v22 }
 0x352   :  { %2768 = vmatpush.bf16.xpose.msrb.mxu2 %v2759_v23 }
 0x357   :  { %v2884_v25 = vpop.permute.xlu1 %2883  ;;  %v2907_v35 = vpop.permute.xlu2 %2906 }
 0x358   :  { %v2882_v26 = vpop.permute.xlu0 %2881  ;;  %v2889_v28 = vsel %vm2093_vm9, %v2884_v25, 0  ;;  %v2912_v36 = vsel %vm2093_vm9, %v2907_v35, 0 }
 0x359   :  { %4345 = vmatmul.msk.bf16.vlgmr.msrb.gmra.mxu3 %vm2093_vm9, %v2385_v16 }
 0x35f   :  { %v2777_v27 = vpop.permute.xlu1 %2776  ;;  %v5670_v21 = vpop.permute.xlu2 %2433 }
 0x360   :  { %v2647_v18 = vpop.permute.xlu0 %2646  ;;  %v2782_v43 = vsel %vm2093_vm9, %v2777_v27, 0 }
 0x361   :  { %v2652_v29 = vsel %vm2093_vm9, %v2647_v18, 0  ;;  %4352 = vmatmul.msk.bf16.vlgmr.msra.gmra.mxu2 %vm2093_vm9, %v2622_v20 }
 0x362   :  { %2898 = vmatpush.bf16.xpose.msra.mxu2 %v2889_v28  ;;  %2661 = vmatpush.bf16.xpose.msrb.mxu3 %v2652_v29 }
 0x367   :  { %v3012_v31 = vpop.permute.xlu1 %3011  ;;  %v3035_v24 = vpop.permute.xlu2 %3034 }
 0x368   :  { %v2775_v30 = vpop.permute.xlu0 %2774 }
 0x369   :  { %4349 = vmatmul.msk.bf16.vlgmr.msra.gmra.mxu3 %vm2093_vm9, %v2515_v15 }
 0x36a   :  { %2791 = vmatpush.bf16.xpose.msra.mxu3 %v2782_v43 }
 0x36f   :  { %v2301_v32 = vpop.permute.xlu1 %2300 }
 0x370   :  { %v2306_v33 = vsel %vm2166_vm8, %v2301_v32, 0  ;;  %v5663_v37 = vpop.permute.xlu0 %2454 }
 0x371   :  { %4356 = vmatmul.msk.bf16.vlgmr.msrb.gmra.mxu2 %vm2093_vm9, %v2752_v2  ;;  %2315 = vmatpush.bf16.msrb.mxu0 %v2306_v33 }
 0x372   :  { %3028 = vmatpush.bf16.xpose.msrb.mxu2 %v3019_v34 }
 0x377   :  { %v2905_v38 = vpop.permute.xlu1 %2904 }
 0x378   :  { %v3037_v7 = vpop.permute.xlu0 %3036 }
 0x379   :  { %4353 = vmatmul.msk.bf16.vlgmr.msrb.gmra.mxu3 %vm2093_vm9, %v2645_v8  ;;  %v3042_v9 = vsel %vm2093_vm9, %v3037_v7, 0 }
 0x37a   :  { %2921 = vmatpush.bf16.xpose.msrb.mxu3 %v2912_v36 }
 0x381   :  { %4360 = vmatmul.msk.bf16.vlgmr.msra.gmra.mxu2 %vm2093_vm9, %v2882_v26 }
 0x389   :  { %4357 = vmatmul.msk.bf16.vlgmr.msra.gmra.mxu3 %vm2093_vm9, %v2775_v30 }
 0x38a   :  { %3051 = vmatpush.bf16.xpose.msra.mxu3 %v3042_v9 }
 0x391   :  { %4364 = vmatmul.msk.bf16.vlgmr.msrb.gmra.mxu2 %vm2093_vm9, %v3012_v31 }
 0x399   :  { %4361 = vmatmul.msk.bf16.vlgmr.msrb.gmra.mxu3 %vm2093_vm9, %v2905_v38 }
 0x3a9   :  { %4365 = vmatmul.msk.bf16.vlgmr.msra.gmra.mxu3 %vm2093_vm9, %v3035_v24 }
 0x3ae   :  { %v2109_v39 = vpop.f32.mrf.mxu1 }
 0x3af   :  { %v5673_v42 = vmul.f32 0.35355338, %v2109_v39 }
 0x3b1   :  { %v2139_v44 = vsel %vm2093_vm9, %v5673_v42, -inf }
 0x3b2   :  { %2140 = vmax.xlane.f32.xlu0 %v2139_v44 }
 0x3b3   :  { %v2244_v45 = vpop.f32.mrf.mxu2 }
 0x3b4   :  { %v5677_v46 = vmul.f32 0.35355338, %v2244_v45 }
 0x3b6   :  { %v2111_v47 = vpop.f32.mrf.mxu1  ;;  %v2273_v48 = vsel %vm2093_vm9, %v5677_v46, -inf }
 0x3b7   :  { %2274 = vmax.xlane.f32.xlu2 %v2273_v48 }
 0x3bb   :  { %v2246_v49 = vpop.f32.mrf.mxu2 }
 0x3bc   :  { %v2133_v51 = vpop.f32.mrf.mxu3 }
 0x3bd   :  { %v5681_v53 = vmul.f32 0.35355338, %v2133_v51 }
 0x3bf   :  { %v2142_v54 = vsel %vm2093_vm9, %v5681_v53, -inf }
 0x3c0   :  { %2143 = vmax.xlane.f32.xlu1 %v2142_v54 }
 0x3c4   :  { %v2135_v55 = vpop.f32.mrf.mxu3  ;;  %v2380_v56 = vpop.f32.mrf.mxu2 }
 0x3c5   :  { %v5685_v57 = vmul.f32 0.35355338, %v2380_v56 }
 0x3c7   :  { %v2409_v58 = vsel %vm2093_vm9, %v5685_v57, -inf }
 0x3c8   :  { %2410 = vmax.xlane.f32.xlu0 %v2409_v58 }
 0x3cc   :  { %v2267_v40 = vpop.f32.mrf.mxu3  ;;  %v2382_v59 = vpop.f32.mrf.mxu2 }
 0x3cd   :  { %v5689_v60 = vmul.f32 0.35355338, %v2267_v40 }
 0x3cf   :  { %v2276_v61 = vsel %vm2093_vm9, %v5689_v60, -inf }
 0x3d0   :  { %2277 = vmax.xlane.f32.xlu2 %v2276_v61 }
 0x3d4   :  { %v2269_v62 = vpop.f32.mrf.mxu3  ;;  %v2510_v63 = vpop.f32.mrf.mxu2 }
 0x3d5   :  { %v5711_v20 = vmul.f32 0.35355338, %v2510_v63 }
 0x3d7   :  { %v2539_v25 = vsel %vm2093_vm9, %v5711_v20, -inf }
 0x3d9   :  { %2584 = vrot.lane.b32.xlu1 %v5613_v50, %s4724_s27 }
 0x3dc   :  { %2693 = vrot.lane.b32.xlu0 %v5620_v52, %s4727_s2  ;;  %v2403_v0 = vpop.f32.mrf.mxu3  ;;  %v2512_v1 = vpop.f32.mrf.mxu2 }
 0x3dd   :  { %v5701_v12 = vmul.f32 0.35355338, %v2403_v0 }
 0x3df   :  { %v2412_v13 = vsel %vm2093_vm9, %v5701_v12, -inf }
 0x3e4   :  { %2714 = vrot.lane.b32.xlu0 %v5613_v50, %s4727_s2  ;;  %v2405_v2 = vpop.f32.mrf.mxu3  ;;  %v2640_v3 = vpop.f32.mrf.mxu2 }
 0x3e5   :  { %v5707_v17 = vmul.f32 0.35355338, %v2640_v3 }
 0x3e7   :  { %v2669_v23 = vsel %vm2093_vm9, %v5707_v17, -inf }
 0x3e8   :  { %2563 = vrot.lane.b32.xlu2 %v5620_v52, %s4724_s27 }
 0x3ec   :  { %v2533_v4 = vpop.f32.mrf.mxu3  ;;  %v2642_v5 = vpop.f32.mrf.mxu2 }
 0x3ed   :  { %v5717_v26 = vmul.f32 0.35355338, %v2533_v4 }
 0x3ef   :  { %v2542_v29 = vsel %vm2093_vm9, %v5717_v26, -inf }
 0x3f4   :  { %v2535_v6 = vpop.f32.mrf.mxu3  ;;  %v2770_v8 = vpop.f32.mrf.mxu2 }
 0x3f5   :  { %v5725_v43 = vmul.f32 0.35355338, %v2770_v8 }
 0x3f7   :  { %v2799_v34 = vsel %vm2093_vm9, %v5725_v43, -inf }
 0x3fc   :  { %v2663_v10 = vpop.f32.mrf.mxu3  ;;  %v2772_v11 = vpop.f32.mrf.mxu2 }
 0x3fd   :  { %v5705_v16 = vmul.f32 0.35355338, %v2663_v10 }
 0x3ff   :  { %v2672_v19 = vsel %vm2093_vm9, %v5705_v16, -inf }
 0x403   :  { %2413 = vmax.xlane.f32.xlu1 %v2412_v13 }
 0x404   :  { %v2665_v14 = vpop.f32.mrf.mxu3  ;;  %v2900_v15 = vpop.f32.mrf.mxu2 }
 0x405   :  { %v5719_v27 = vmul.f32 0.35355338, %v2900_v15 }
 0x407   :  { %v2929_v31 = vsel %vm2093_vm9, %v5719_v27, -inf }
 0x40b   :  { %2673 = vmax.xlane.f32.xlu1 %v2672_v19 }
 0x40c   :  { %v2793_v22 = vpop.f32.mrf.mxu3  ;;  %v2902_v41 = vpop.f32.mrf.mxu2 }
 0x40d   :  { %v5729_v30 = vmul.f32 0.35355338, %v2793_v22 }
 0x40e   :  { %2670 = vmax.xlane.f32.xlu0 %v2669_v23 }
 0x40f   :  { %v2802_v7 = vsel %vm2093_vm9, %v5729_v30, -inf }
 0x411   :  { %2540 = vmax.xlane.f32.xlu2 %v2539_v25 }
 0x414   :  { %v2795_v18 = vpop.f32.mrf.mxu3  ;;  %v3030_v28 = vpop.f32.mrf.mxu2 }
 0x415   :  { %v5734_v24 = vmul.f32 0.35355338, %v3030_v28 }
 0x416   :  { %2543 = vmax.xlane.f32.xlu0 %v2542_v29 }
 0x417   :  { %v3059_v48 = vsel %vm2093_vm9, %v5734_v24, -inf }
 0x419   :  { %2930 = vmax.xlane.f32.xlu2 %v2929_v31 }
 0x41c   :  { %v2923_v32 = vpop.f32.mrf.mxu3  ;;  %v3032_v33 = vpop.f32.mrf.mxu2 }
 0x41d   :  { %v5741_v51 = vmul.f32 0.35355338, %v2923_v32 }
 0x41e   :  { %2800 = vmax.xlane.f32.xlu0 %v2799_v34 }
 0x41f   :  { %v2932_v58 = vsel %vm2093_vm9, %v5741_v51, -inf }
 0x424   :  { %v2925_v35 = vpop.f32.mrf.mxu3 }
 0x425   :  { %v2141_v36 = vpop.xlane.xlu0 %2140 }
 0x426   :  { %v2145_v9 = vsub.f32 %v5673_v42, %v2141_v36  ;;  %2803 = vmax.xlane.f32.xlu0 %v2802_v7 }
 0x428   :  { %v2147_v38 = vmul.f32 1.442695, %v2145_v9 }
 0x42a   :  { %4626 = vpow2.f32 %v2147_v38  ;;  %v2275_v39 = vpop.xlane.xlu2 %2274 }
 0x42b   :  { %v2279_v44 = vsub.f32 %v5677_v46, %v2275_v39 }
 0x42c   :  { %v3053_v45 = vpop.f32.mrf.mxu3 }
 0x42d   :  { %v2281_v47 = vmul.f32 1.442695, %v2279_v44  ;;  %v5752_v61 = vmul.f32 0.35355338, %v3053_v45 }
 0x42e   :  { %3060 = vmax.xlane.f32.xlu0 %v3059_v48 }
 0x42f   :  { %4628 = vpow2.f32 %v2281_v47 }
 0x430   :  { %v5739_v49 = vpop.eup %4626 }
 0x431   :  { %v2151_v42 = vsel %vm2093_vm9, %v5739_v49, 0.0 }
 0x432   :  { %2152 = vadd.xlane.f32.xlu1 %v2151_v42 }
 0x433   :  { %v2144_v54 = vpop.xlane.xlu1 %2143 }
 0x434   :  { %v2146_v55 = vsub.f32 %v5681_v53, %v2144_v54  ;;  %v3055_v56 = vpop.f32.mrf.mxu3  ;;  %v3062_v53 = vsel %vm2093_vm9, %v5752_v61, -inf }
 0x435   :  { %v5746_v46 = vpop.eup %4628 }
 0x436   :  { %v2149_v40 = vmul.f32 1.442695, %v2146_v55  ;;  %2933 = vmax.xlane.f32.xlu0 %v2932_v58  ;;  %v2285_v59 = vsel %vm2093_vm9, %v5746_v46, 0.0 }
 0x437   :  { %2286 = vadd.xlane.f32.xlu2 %v2285_v59 }
 0x438   :  { %4630 = vpow2.f32 %v2149_v40 }
 0x43b   :  { %v2411_v62 = vpop.xlane.xlu0 %2410 }
 0x43c   :  { %v2415_v63 = vsub.f32 %v5685_v57, %v2411_v62  ;;  %v2439_v62 = vsel %vm2166_vm8, %v5670_v21, 0 }
 0x43e   :  { %v5757_v0 = vpop.eup %4630  ;;  %v2417_v1 = vmul.f32 1.442695, %v2415_v63  ;;  %3063 = vmax.xlane.f32.xlu0 %v3062_v53 }
 0x43f   :  { %v2154_v2 = vsel %vm2093_vm9, %v5757_v0, 0.0 }
 0x440   :  { %4632 = vpow2.f32 %v2417_v1  ;;  %2155 = vadd.xlane.f32.xlu2 %v2154_v2 }
 0x443   :  { %v2278_v3 = vpop.xlane.xlu2 %2277 }
 0x444   :  { %v2280_v4 = vsub.f32 %v5689_v60, %v2278_v3 }
 0x446   :  { %v5762_v5 = vpop.eup %4632  ;;  %v2283_v6 = vmul.f32 1.442695, %v2280_v4 }
 0x447   :  { %v2421_v57 = vsel %vm2093_vm9, %v5762_v5, 0.0 }
 0x448   :  { %4634 = vpow2.f32 %v2283_v6  ;;  %2422 = vadd.xlane.f32.xlu0 %v2421_v57  ;;  %v2460_v57 = vsel %vm2166_vm8, %v5663_v37, 0 }
 0x44b   :  { %v5776_v13 = vpop.permute.xlu1 %2584  ;;  %v5778_v14 = vpop.permute.xlu2 %2563 }
 0x44e   :  { %v5766_v8 = vpop.eup %4634  ;;  %v5772_v11 = vpop.permute.xlu0 %2693 }
 0x44f   :  { %v2288_v10 = vsel %vm2093_vm9, %v5766_v8, 0.0 }
 0x450   :  { %2289 = vadd.xlane.f32.xlu0 %v2288_v10 }
 0x456   :  { %v5774_v60 = vpop.permute.xlu0 %2714 }
 0x464   :  { %2953 = vrot.lane.b32.xlu0 %v5620_v52, %s4730_s14 }
 0x476   :  { %v2414_v22 = vpop.xlane.xlu1 %2413 }
 0x477   :  { %v2416_v18 = vsub.f32 %v5701_v12, %v2414_v22 }
 0x479   :  { %v2419_v31 = vmul.f32 1.442695, %v2416_v18 }
 0x47e   :  { %v5801_v45 = vpop.xlane.xlu1 %2673 }
 0x481   :  { %v2671_v15 = vpop.xlane.xlu0 %2670 }
 0x482   :  { %v2675_v19 = vsub.f32 %v5707_v17, %v2671_v15 }
 0x484   :  { %v2677_v41 = vmul.f32 1.442695, %v2675_v19  ;;  %v2541_v23 = vpop.xlane.xlu2 %2540  ;;  %v2569_v19 = vsel %vm2166_vm8, %v5778_v14, 0 }
 0x485   :  { %v2545_v25 = vsub.f32 %v5711_v20, %v2541_v23 }
 0x486   :  { %4636 = vpow2.f32 %v2677_v41 }
 0x487   :  { %v2547_v28 = vmul.f32 1.442695, %v2545_v25 }
 0x489   :  { %4638 = vpow2.f32 %v2547_v28  ;;  %v2544_v29 = vpop.xlane.xlu0 %2543 }
 0x48a   :  { %4640 = vpow2.f32 %v2419_v31  ;;  %v2546_v17 = vsub.f32 %v5717_v26, %v2544_v29 }
 0x48c   :  { %v5783_v32 = vpop.eup %4636  ;;  %v2549_v36 = vmul.f32 1.442695, %v2546_v17  ;;  %v5807_v42 = vpop.xlane.xlu2 %2930 }
 0x48d   :  { %v2681_v33 = vsel %vm2093_vm9, %v5783_v32, 0.0 }
 0x48e   :  { %2682 = vadd.xlane.f32.xlu2 %v2681_v33 }
 0x48f   :  { %v5787_v34 = vpop.eup %4638 }
 0x490   :  { %v2551_v20 = vsel %vm2093_vm9, %v5787_v34, 0.0  ;;  %v5793_v9 = vpop.eup %4640 }
 0x491   :  { %2552 = vadd.xlane.f32.xlu1 %v2551_v20  ;;  %v2801_v12 = vpop.xlane.xlu0 %2800  ;;  %v2424_v38 = vsel %vm2093_vm9, %v5793_v9, 0.0 }
 0x492   :  { %v2805_v35 = vsub.f32 %v5725_v43, %v2801_v12 }
 0x494   :  { %v2807_v7 = vmul.f32 1.442695, %v2805_v35 }
 0x496   :  { %4642 = vpow2.f32 %v2807_v7 }
 0x497   :  { %4644 = vpow2.f32 %v2549_v36 }
 0x499   :  { %2425 = vadd.xlane.f32.xlu1 %v2424_v38  ;;  %v2804_v39 = vpop.xlane.xlu0 %2803 }
 0x49a   :  { %v2806_v4 = vsub.f32 %v5729_v30, %v2804_v39 }
 0x49c   :  { %v5797_v44 = vpop.eup %4642  ;;  %v2809_v15 = vmul.f32 1.442695, %v2806_v4 }
 0x49d   :  { %v5799_v26 = vpop.eup %4644  ;;  %v2811_v43 = vsel %vm2093_vm9, %v5797_v44, 0.0 }
 0x49e   :  { %2812 = vadd.xlane.f32.xlu0 %v2811_v43  ;;  %v2554_v47 = vsel %vm2093_vm9, %v5799_v26, 0.0 }
 0x4a1   :  { %2555 = vadd.xlane.f32.xlu1 %v2554_v47  ;;  %v3061_v48 = vpop.xlane.xlu0 %3060 }
 0x4a2   :  { %v3065_v41 = vsub.f32 %v5734_v24, %v3061_v48  ;;  %v2699_v24 = vsel %vm2166_vm8, %v5772_v11, 0  ;;  %v2935_v11 = vsub.f32 %v5719_v27, %v5807_v42 }
 0x4a4   :  { %v3067_v28 = vmul.f32 1.442695, %v3065_v41  ;;  %v2937_v20 = vmul.f32 1.442695, %v2935_v11 }
 0x4a5   :  { %v2153_v54 = vpop.xlane.xlu1 %2152 }
 0x4a6   :  { %2844 = vrot.lane.b32.xlu2 %v5613_v50, %s4726_s29  ;;  %4646 = vrcp.f32 %v2153_v54 }
 0x4a9   :  { %v2934_v55 = vpop.xlane.xlu0 %2933 }
 0x4aa   :  { %v2287_v56 = vpop.xlane.xlu2 %2286  ;;  %v2936_v30 = vsub.f32 %v5741_v51, %v2934_v55  ;;  %v2590_v51 = vsel %vm2166_vm8, %v5776_v13, 0 }
 0x4ab   :  { %4648 = vrcp.f32 %v2287_v56 }
 0x4ac   :  { %v4647_v58 = vpop.eup %4646  ;;  %v2939_v22 = vmul.f32 1.442695, %v2936_v30 }
 0x4ad   :  { %v2159_v40 = vmul.f32 %v4647_v58, %v5739_v49 }
 0x4af   :  { %v2161_v59 = vpack.c.bf16 %v2159_v40, %v2159_v40 }
 0x4b1   :  { %4338 = vmatmul.msk.bf16.vlgmr.msra.gmra.mxu0 %vm2093_vm9, %v2161_v59  ;;  %v3064_v63 = vpop.xlane.xlu0 %3063  ;;  %v4649_v1 = vpop.eup %4648 }
 0x4b2   :  { %2974 = vrot.lane.b32.xlu0 %v5613_v50, %s4730_s14  ;;  %2448 = vmatpush.bf16.msra.mxu0 %v2439_v62  ;;  %v2293_v21 = vmul.f32 %v4649_v1, %v5746_v46  ;;  %v3066_v35 = vsub.f32 %v5752_v61, %v3064_v63 }
 0x4b3   :  { %v2156_v53 = vpop.xlane.xlu2 %2155 }
 0x4b4   :  { %4650 = vrcp.f32 %v2156_v53  ;;  %v2295_v10 = vpack.c.bf16 %v2293_v21, %v2293_v21  ;;  %v3069_v7 = vmul.f32 1.442695, %v3066_v35 }
 0x4ba   :  { %v4651_v2 = vpop.eup %4650  ;;  %2823 = vrot.lane.b32.xlu1 %v5620_v52, %s4726_s29  ;;  %s4734_s29 = smov [#allocation2]  }
 0x4bb   :  { %v2160_v49 = vmul.f32 %v4651_v2, %v5757_v0  ;;  %v2423_v3 = vpop.xlane.xlu0 %2422  ;;  %s3313_s2 = sshll.u32 %s4734_s29, 4  ;;  %s3314_s2 = int_to_ptr.vmem [resolvable:$true] %s3313_s2 }
 0x4bc   :  { %4652 = vrcp.f32 %v2423_v3 }
 0x4bd   :  { %v2162_v6 = vpack.c.bf16 %v2160_v49, %v2160_v49 }
 0x4bf   :  { %4339 = vmatmul.msk.bf16.vlgmr.msra.gmra.mxu1 %vm2093_vm9, %v2162_v6  ;;  %v4733_v6 = vmov 8.0  }
 0x4c0   :  { %2469 = vmatpush.bf16.msra.mxu1 %v2460_v57 }
 0x4c1   :  { %4342 = vmatmul.msk.bf16.vlgmr.msrb.gmra.mxu0 %vm2093_vm9, %v2295_v10 }
 0x4c2   :  { %2578 = vmatpush.bf16.msrb.mxu0 %v2569_v19  ;;  %v4653_v46 = vpop.eup %4652 }
 0x4c3   :  { %v2290_v0 = vpop.xlane.xlu0 %2289  ;;  %v2429_v14 = vmul.f32 %v4653_v46, %v5762_v5  ;;  %v2676_v5 = vsub.f32 %v5705_v16, %v5801_v45 }
 0x4c4   :  { %4654 = vrcp.f32 %v2290_v0 }
 0x4c5   :  { %4656 = vpow2.f32 %v2809_v15  ;;  %v2431_v31 = vpack.c.bf16 %v2429_v14, %v2429_v14  ;;  %v2679_v33 = vmul.f32 1.442695, %v2676_v5 }
 0x4c6   :  { %4658 = vpow2.f32 %v2939_v22 }
 0x4c7   :  { %4660 = vpow2.f32 %v3067_v28 }
 0x4c8   :  { %4662 = vpow2.f32 %v2679_v33 }
 0x4c9   :  { %4664 = vpow2.f32 %v2937_v20 }
 0x4ca   :  { %v4655_v37 = vpop.eup %4654  ;;  %4666 = vpow2.f32 %v3069_v7 }
 0x4cb   :  { %v5830_v23 = vpop.eup %4656  ;;  %v2294_v25 = vmul.f32 %v4655_v37, %v5766_v8 }
 0x4cc   :  { %v2814_v29 = vsel %vm2093_vm9, %v5830_v23, 0.0  ;;  %v5844_v8 = vpop.eup %4658 }
 0x4cd   :  { %v2296_v18 = vpack.c.bf16 %v2294_v25, %v2294_v25  ;;  %v2944_v13 = vsel %vm2093_vm9, %v5844_v8, 0.0  ;;  %v5848_v17 = vpop.eup %4660 }
 0x4ce   :  { %v3071_v16 = vsel %vm2093_vm9, %v5848_v17, 0.0  ;;  %v5854_v12 = vpop.eup %4662 }
 0x4cf   :  { %2815 = vadd.xlane.f32.xlu2 %v2814_v29  ;;  %4343 = vmatmul.msk.bf16.vlgmr.msrb.gmra.mxu1 %vm2093_vm9, %v2296_v18  ;;  %v2684_v36 = vsel %vm2093_vm9, %v5854_v12, 0.0  ;;  %v5859_v38 = vpop.eup %4664 }
 0x4d0   :  { %2599 = vmatpush.bf16.msrb.mxu1 %v2590_v51  ;;  %v2941_v27 = vsel %vm2093_vm9, %v5859_v38, 0.0  ;;  %v5865_v39 = vpop.eup %4666 }
 0x4d1   :  { %4346 = vmatmul.msk.bf16.vlgmr.msra.gmra.mxu0 %vm2093_vm9, %v2431_v31  ;;  %v3074_v61 = vsel %vm2093_vm9, %v5865_v39, 0.0 }
 0x4d2   :  { %2708 = vmatpush.bf16.msra.mxu0 %v2699_v24 }
 0x4d6   :  { %v2954_v59 = vpop.permute.xlu0 %2953 }
 0x4d7   :  { %2945 = vadd.xlane.f32.xlu2 %v2944_v13  ;;  %v2959_v4 = vsel %vm2166_vm8, %v2954_v59, 0 }
 0x4dc   :  { %3072 = vadd.xlane.f32.xlu0 %v3071_v16 }
 0x4e4   :  { %2685 = vadd.xlane.f32.xlu1 %v2684_v36 }
 0x4ec   :  { %2942 = vadd.xlane.f32.xlu1 %v2941_v27 }
 0x4ef   :  { %3083 = vrot.lane.b32.xlu2 %v5620_v52, %s4732_s15 }
 0x4f4   :  { %3075 = vadd.xlane.f32.xlu1 %v3074_v61 }
 0x501   :  { %v2683_v42 = vpop.xlane.xlu2 %2682 }
 0x504   :  { %v2553_v45 = vpop.xlane.xlu1 %2552 }
 0x505   :  { %4668 = vrcp.f32 %v2553_v45 }
 0x509   :  { %v2845_v1 = vpop.permute.xlu2 %2844 }
 0x50a   :  { %v2850_v3 = vsel %vm2166_vm8, %v2845_v1, 0 }
 0x50b   :  { %v4669_v43 = vpop.eup %4668 }
 0x50c   :  { %v2559_v47 = vmul.f32 %v4669_v43, %v5787_v34  ;;  %v2426_v48 = vpop.xlane.xlu1 %2425  ;;  %v2720_v34 = vsel %vm2166_vm8, %v5774_v60, 0 }
 0x50d   :  { %4670 = vrcp.f32 %v2426_v48  ;;  %3104 = vrot.lane.b32.xlu1 %v5613_v50, %s4732_s15 }
 0x50e   :  { %v2561_v54 = vpack.c.bf16 %v2559_v47, %v2559_v47  ;;  %4672 = vrcp.f32 %v2683_v42 }
 0x510   :  { %4350 = vmatmul.msk.bf16.vlgmr.msrb.gmra.mxu0 %vm2093_vm9, %v2561_v54 }
 0x511   :  { %v2813_v53 = vpop.xlane.xlu0 %2812 }
 0x513   :  { %v4671_v52 = vpop.eup %4670 }
 0x514   :  { %v2430_v55 = vmul.f32 %v4671_v52, %v5793_v9  ;;  %v2556_v58 = vpop.xlane.xlu1 %2555  ;;  %v4673_v40 = vpop.eup %4672 }
 0x515   :  { %4674 = vrcp.f32 %v2556_v58  ;;  %v2689_v50 = vmul.f32 %v4673_v40, %v5783_v32 }
 0x516   :  { %v2432_v56 = vpack.c.bf16 %v2430_v55, %v2430_v55  ;;  %4676 = vrcp.f32 %v2813_v53 }
 0x517   :  { %v2691_v62 = vpack.c.bf16 %v2689_v50, %v2689_v50  ;;  %4678 = vrcp.f32 %v4733_v6 }
 0x518   :  { %4347 = vmatmul.msk.bf16.vlgmr.msra.gmra.mxu1 %vm2093_vm9, %v2432_v56 }
 0x519   :  { %2729 = vmatpush.bf16.msra.mxu1 %v2720_v34 }
 0x51b   :  { %v4675_v63 = vpop.eup %4674 }
 0x51c   :  { %v2560_v9 = vmul.f32 %v4675_v63, %v5799_v26  ;;  %v4677_v49 = vpop.eup %4676 }
 0x51d   :  { %v2819_v60 = vmul.f32 %v4677_v49, %v5797_v44  ;;  %v4679_v19 = vpop.eup %4678 }
 0x51e   :  { %v2562_v2 = vpack.c.bf16 %v2560_v9, %v2560_v9  ;;  %v2217_v30 = vmul.f32 8.0, %v4679_v19  ;;  %vm2221_vm10 = vweird.f32 %v4679_v19 }
 0x51f   :  { %v2821_v57 = vpack.c.bf16 %v2819_v60, %v2819_v60 }
 0x520   :  { %4354 = vmatmul.msk.bf16.vlgmr.msra.gmra.mxu0 %vm2093_vm9, %v2691_v62  ;;  %v2218_v22 = vsub.f32 1.0, %v2217_v30 }
 0x522   :  { %v2219_v18 = vmul.f32 %v4679_v19, %v2218_v22 }
 0x524   :  { %v2220_v13 = vadd.f32 %v4679_v19, %v2219_v18 }
 0x526   :  { %v5889_v7 = vsel %vm2221_vm10, %v4679_v19, %v2220_v13 }
 0x528   :  { %4351 = vmatmul.msk.bf16.vlgmr.msrb.gmra.mxu1 %vm2093_vm9, %v2562_v2 }
 0x529   :  { %2859 = vmatpush.bf16.msrb.mxu1 %v2850_v3 }
 0x52c   :  { %v2824_v21 = vpop.permute.xlu1 %2823 }
 0x52d   :  { %v2829_v32 = vsel %vm2166_vm8, %v2824_v21, 0 }
 0x52e   :  { %2838 = vmatpush.bf16.msrb.mxu0 %v2829_v32  ;;  %v2179_v26 = vpop.f32.mrf.mxu0 }
 0x52f   :  { %v2202_v10 = vsel %vm2093_vm9, %v2179_v26, 0.0  ;;  %v2975_v26 = vpop.permute.xlu0 %2974 }
 0x530   :  { %v2203_v15 = vrot.slane %v2202_v10, 4 }
 0x531   :  { %4358 = vmatmul.msk.bf16.vlgmr.msrb.gmra.mxu0 %vm2093_vm9, %v2821_v57 }
 0x532   :  { %2968 = vmatpush.bf16.msra.mxu0 %v2959_v4  ;;  %v2204_v0 = vadd.f32 %v2203_v15, %v2202_v10  ;;  %v2980_v15 = vsel %vm2166_vm8, %v2975_v26, 0 }
 0x534   :  { %v2205_v46 = vrot.slane %v2204_v0, 2 }
 0x536   :  { %v2181_v44 = vpop.f32.mrf.mxu0  ;;  %v2206_v25 = vadd.f32 %v2205_v46, %v2204_v0 }
 0x538   :  { %v2207_v31 = vrot.slane %v2206_v25, 1 }
 0x53a   :  { %v2208_v20 = vadd.f32 %v2207_v31, %v2206_v25 }
 0x53c   :  { %v2198_v37 = vpop.f32.mrf.mxu1  ;;  %v2223_v45 = vmul.f32 %v5889_v7, %v2208_v20 }
 0x53d   :  { %v2209_v41 = vsel %vm2093_vm9, %v2198_v37, 0.0 }
 0x53e   :  { %v2210_v14 = vrot.slane %v2209_v41, 4  ;;  %v2317_v28 = vpop.f32.mrf.mxu0 }
 0x53f   :  { %v2345_v51 = vsel %vm2093_vm9, %v2317_v28, 0.0 }
 0x540   :  { %v2211_v29 = vadd.f32 %v2210_v14, %v2209_v41  ;;  %v2346_v5 = vrot.slane %v2345_v51, 4 }
 0x542   :  { %v2212_v24 = vrot.slane %v2211_v29, 2  ;;  %v2816_v33 = vpop.xlane.xlu2 %2815  ;;  %v2347_v36 = vadd.f32 %v2346_v5, %v2345_v51 }
 0x544   :  { %v2213_v11 = vadd.f32 %v2212_v24, %v2211_v29  ;;  %v2200_v16 = vpop.f32.mrf.mxu1  ;;  %v2348_v47 = vrot.slane %v2347_v36, 2 }
 0x546   :  { %v2214_v35 = vrot.slane %v2213_v11, 1  ;;  %v2319_v27 = vpop.f32.mrf.mxu0  ;;  %v2349_v55 = vadd.f32 %v2348_v47, %v2347_v36 }
 0x548   :  { %v2215_v61 = vadd.f32 %v2214_v35, %v2213_v11  ;;  %v2350_v59 = vrot.slane %v2349_v55, 1 }
 0x54a   :  { %v2224_v43 = vmul.f32 %v5889_v7, %v2215_v61  ;;  %v2946_v48 = vpop.xlane.xlu2 %2945  ;;  %v2351_v9 = vadd.f32 %v2350_v59, %v2349_v55 }
 0x54c   :  { %v2341_v42 = vpop.f32.mrf.mxu1  ;;  %v5894_v54 = vsel %vm3143_vm11, %v2224_v43, %v2223_v45  ;;  %v2359_v60 = vmul.f32 %v2351_v9, %v5889_v7 }
 0x54d   :  { %v2352_v52 = vsel %vm2093_vm9, %v2341_v42, 0.0 }
 0x54e   :  { %v2353_v56 = vrot.slane %v2352_v52, 4  ;;  %v2450_v58 = vpop.f32.mrf.mxu0 }
 0x54f   :  { %v3073_v30 = vpop.xlane.xlu0 %3072 }
 0x550   :  { %v2354_v40 = vadd.f32 %v2353_v56, %v2352_v52 }
 0x552   :  { %v2355_v34 = vrot.slane %v2354_v40, 2  ;;  %v3084_v50 = vpop.permute.xlu2 %3083 }
 0x553   :  { %v3089_v62 = vsel %vm2166_vm8, %v3084_v50, 0 }
 0x554   :  { %v2356_v63 = vadd.f32 %v2355_v34, %v2354_v40  ;;  %v2343_v53 = vpop.f32.mrf.mxu1  ;;  %3098 = vmatpush.bf16.msrb.mxu0 %v3089_v62 }
 0x556   :  { %v2357_v1 = vrot.slane %v2356_v63, 1  ;;  %v2452_v2 = vpop.f32.mrf.mxu0 }
 0x557   :  { %v2686_v49 = vpop.xlane.xlu1 %2685 }
 0x558   :  { %v2358_v3 = vadd.f32 %v2357_v1, %v2356_v63  ;;  %4680 = vrcp.f32 %v2686_v49 }
 0x55a   :  { %v2360_v21 = vmul.f32 %v2358_v3, %v5889_v7 }
 0x55c   :  { %v3148_v32 = vsel %vm3143_vm11, %v2360_v21, %v2359_v60 }
 0x55d   :  { %3149 = vrot.lane.b32.xlu2 %v3148_v32, %s4731_s4 }
 0x55e   :  { %v4681_v4 = vpop.eup %4680 }
 0x55f   :  { %v2690_v6 = vmul.f32 %v4681_v4, %v5854_v12  ;;  %v2943_v57 = vpop.xlane.xlu1 %2942 }
 0x560   :  { %4682 = vrcp.f32 %v2943_v57 }
 0x561   :  { %v2692_v10 = vpack.c.bf16 %v2690_v6, %v2690_v6  ;;  %4684 = vrcp.f32 %v2816_v33 }
 0x562   :  { %4686 = vrcp.f32 %v3073_v30 }
 0x563   :  { %4355 = vmatmul.msk.bf16.vlgmr.msra.gmra.mxu1 %vm2093_vm9, %v2692_v10  ;;  %4688 = vrcp.f32 %v2946_v48 }
 0x564   :  { %2989 = vmatpush.bf16.msra.mxu1 %v2980_v15 }
 0x566   :  { %v4683_v19 = vpop.eup %4682 }
 0x567   :  { %v2949_v0 = vmul.f32 %v4683_v19, %v5859_v38  ;;  %v4685_v46 = vpop.eup %4684  ;;  %v3076_v25 = vpop.xlane.xlu1 %3075 }
 0x568   :  { %v2820_v12 = vmul.f32 %v4685_v46, %v5830_v23  ;;  %v4687_v37 = vpop.eup %4686  ;;  %4690 = vrcp.f32 %v3076_v25  ;;  %v2475_v23 = vsel %vm2093_vm9, %v2450_v58, 0.0 }
 0x569   :  { %v2951_v44 = vpack.c.bf16 %v2949_v0, %v2949_v0  ;;  %v3079_v41 = vmul.f32 %v4687_v37, %v5848_v17  ;;  %v4689_v18 = vpop.eup %4688  ;;  %v2476_v24 = vrot.slane %v2475_v23, 4 }
 0x56a   :  { %v2822_v22 = vpack.c.bf16 %v2820_v12, %v2820_v12  ;;  %v2950_v38 = vmul.f32 %v4689_v18, %v5844_v8 }
 0x56b   :  { %4362 = vmatmul.msk.bf16.vlgmr.msra.gmra.mxu0 %vm2093_vm9, %v2951_v44  ;;  %v3081_v14 = vpack.c.bf16 %v3079_v41, %v3079_v41  ;;  %v2477_v33 = vadd.f32 %v2476_v24, %v2475_v23 }
 0x56c   :  { %v2952_v51 = vpack.c.bf16 %v2950_v38, %v2950_v38 }
 0x56d   :  { %v2478_v11 = vrot.slane %v2477_v33, 2 }
 0x56e   :  { %v4691_v31 = vpop.eup %4690 }
 0x56f   :  { %v3080_v17 = vmul.f32 %v4691_v31, %v5865_v39  ;;  %v2479_v35 = vadd.f32 %v2478_v11, %v2477_v33 }
 0x571   :  { %v3082_v13 = vpack.c.bf16 %v3080_v17, %v3080_v17  ;;  %v2480_v45 = vrot.slane %v2479_v35, 1 }
 0x573   :  { %4359 = vmatmul.msk.bf16.vlgmr.msrb.gmra.mxu1 %vm2093_vm9, %v2822_v22  ;;  %v2481_v52 = vadd.f32 %v2480_v45, %v2479_v35 }
 0x575   :  { %v2489_v59 = vmul.f32 %v2481_v52, %v5889_v7 }
 0x57b   :  { %4366 = vmatmul.msk.bf16.vlgmr.msrb.gmra.mxu0 %vm2093_vm9, %v3081_v14 }
 0x57f   :  { %v3105_v28 = vpop.permute.xlu1 %3104 }
 0x580   :  { %v3110_v29 = vsel %vm2166_vm8, %v3105_v28, 0 }
 0x581   :  { %3119 = vmatpush.bf16.msrb.mxu1 %v3110_v29 }
 0x583   :  { %4363 = vmatmul.msk.bf16.vlgmr.msra.gmra.mxu1 %vm2093_vm9, %v2952_v51 }
 0x58d   :  { %v2580_v5 = vpop.f32.mrf.mxu0 }
 0x58e   :  { %v2605_v27 = vsel %vm2093_vm9, %v2580_v5, 0.0 }
 0x58f   :  { %v2606_v43 = vrot.slane %v2605_v27, 4 }
 0x591   :  { %v2607_v55 = vadd.f32 %v2606_v43, %v2605_v27 }
 0x593   :  { %4367 = vmatmul.msk.bf16.vlgmr.msrb.gmra.mxu1 %vm2093_vm9, %v3082_v13  ;;  %v2608_v40 = vrot.slane %v2607_v55, 2 }
 0x595   :  { %v2471_v8 = vpop.f32.mrf.mxu1  ;;  %v2582_v16 = vpop.f32.mrf.mxu0  ;;  %v2609_v9 = vadd.f32 %v2608_v40, %v2607_v55 }
 0x596   :  { %v2482_v20 = vsel %vm2093_vm9, %v2471_v8, 0.0 }
 0x597   :  { %v2483_v36 = vrot.slane %v2482_v20, 4  ;;  %v2610_v49 = vrot.slane %v2609_v9, 1 }
 0x599   :  { %v2484_v61 = vadd.f32 %v2483_v36, %v2482_v20  ;;  %v2611_v4 = vadd.f32 %v2610_v49, %v2609_v9 }
 0x59b   :  { %v2485_v47 = vrot.slane %v2484_v61, 2  ;;  %v2619_v26 = vmul.f32 %v2611_v4, %v5889_v7 }
 0x59d   :  { %v2486_v48 = vadd.f32 %v2485_v47, %v2484_v61  ;;  %v2473_v39 = vpop.f32.mrf.mxu1  ;;  %v2710_v42 = vpop.f32.mrf.mxu0 }
 0x59e   :  { %v2735_v0 = vsel %vm2093_vm9, %v2710_v42, 0.0 }
 0x59f   :  { %v2487_v56 = vrot.slane %v2486_v48, 1  ;;  %v2736_v30 = vrot.slane %v2735_v0, 4 }
 0x5a1   :  { %v2488_v58 = vadd.f32 %v2487_v56, %v2486_v48  ;;  %v2737_v44 = vadd.f32 %v2736_v30, %v2735_v0 }
 0x5a3   :  { %v2490_v34 = vmul.f32 %v2488_v58, %v5889_v7  ;;  %v2738_v46 = vrot.slane %v2737_v44, 2 }
 0x5a5   :  { %v2601_v50 = vpop.f32.mrf.mxu1  ;;  %v2712_v62 = vpop.f32.mrf.mxu0  ;;  %v3154_v63 = vsel %vm3143_vm11, %v2490_v34, %v2489_v59  ;;  %v2739_v37 = vadd.f32 %v2738_v46, %v2737_v44 }
 0x5a6   :  { %v2612_v53 = vsel %vm2093_vm9, %v2601_v50, 0.0  ;;  %3155 = vrot.lane.b32.xlu0 %v3154_v63, %s4729_s5 }
 0x5a7   :  { %v2613_v1 = vrot.slane %v2612_v53, 4  ;;  %v2740_v18 = vrot.slane %v2739_v37, 1 }
 0x5a9   :  { %v2614_v2 = vadd.f32 %v2613_v1, %v2612_v53  ;;  %v2741_v31 = vadd.f32 %v2740_v18, %v2739_v37 }
 0x5ab   :  { %v2615_v3 = vrot.slane %v2614_v2, 2  ;;  %v2749_v13 = vmul.f32 %v2741_v31, %v5889_v7 }
 0x5ad   :  { %v2616_v60 = vadd.f32 %v2615_v3, %v2614_v2  ;;  %v2603_v21 = vpop.f32.mrf.mxu1 }
 0x5ae   :  { %v2840_v32 = vpop.f32.mrf.mxu0 }
 0x5af   :  { %v2617_v6 = vrot.slane %v2616_v60, 1  ;;  %v2865_v25 = vsel %vm2093_vm9, %v2840_v32, 0.0 }
 0x5b0   :  { %v2866_v38 = vrot.slane %v2865_v25, 4 }
 0x5b1   :  { %v2618_v57 = vadd.f32 %v2617_v6, %v2616_v60 }
 0x5b2   :  { %v2867_v24 = vadd.f32 %v2866_v38, %v2865_v25 }
 0x5b3   :  { %v2620_v10 = vmul.f32 %v2618_v57, %v5889_v7 }
 0x5b4   :  { %v2868_v33 = vrot.slane %v2867_v24, 2 }
 0x5b5   :  { %v3160_v15 = vsel %vm3143_vm11, %v2620_v10, %v2619_v26 }
 0x5b6   :  { %3161 = vrot.lane.b32.xlu1 %v3160_v15, %s4728_s30  ;;  %v2842_v19 = vpop.f32.mrf.mxu0  ;;  %v2869_v36 = vadd.f32 %v2868_v33, %v2867_v24  ;;  %v4598_v33 = vld [vmem:[%s5999_s9 + $0x8] sm:$0xff] }
 0x5b8   :  { %v2870_v43 = vrot.slane %v2869_v36, 1 }
 0x5ba   :  { %v2871_v55 = vadd.f32 %v2870_v43, %v2869_v36 }
 0x5bc   :  { %v2879_v34 = vmul.f32 %v2871_v55, %v5889_v7 }
 0x5e0   :  { %v2731_v12 = vpop.f32.mrf.mxu1 }
 0x5e1   :  { %v2742_v22 = vsel %vm2093_vm9, %v2731_v12, 0.0 }
 0x5e2   :  { %v2743_v41 = vrot.slane %v2742_v22, 4 }
 0x5e4   :  { %v2744_v14 = vadd.f32 %v2743_v41, %v2742_v22 }
 0x5e6   :  { %v2745_v28 = vrot.slane %v2744_v14, 2 }
 0x5e8   :  { %v2746_v29 = vadd.f32 %v2745_v28, %v2744_v14  ;;  %v2733_v51 = vpop.f32.mrf.mxu1  ;;  %v2970_v23 = vpop.f32.mrf.mxu0 }
 0x5e9   :  { %v2995_v61 = vsel %vm2093_vm9, %v2970_v23, 0.0 }
 0x5ea   :  { %v2747_v17 = vrot.slane %v2746_v29, 1  ;;  %v2996_v47 = vrot.slane %v2995_v61, 4 }
 0x5ec   :  { %v2748_v5 = vadd.f32 %v2747_v17, %v2746_v29  ;;  %v2997_v56 = vadd.f32 %v2996_v47, %v2995_v61  ;;  %v4600_v17 = vld [vmem:[%s5999_s9 + $0x18] sm:$0xff] }
 0x5ed   :  { %3244 = vmatpush.bf16.msra.mxu2 %v4600_v17 }
 0x5ee   :  { %v2750_v11 = vmul.f32 %v2748_v5, %v5889_v7  ;;  %v2998_v59 = vrot.slane %v2997_v56, 2  ;;  %v4599_v5 = vld [vmem:[%s5999_s9 + $0x10] sm:$0xff] }
 0x5f0   :  { %v2861_v8 = vpop.f32.mrf.mxu1  ;;  %v2972_v16 = vpop.f32.mrf.mxu0  ;;  %v3166_v20 = vsel %vm3143_vm11, %v2750_v11, %v2749_v13  ;;  %v2999_v1 = vadd.f32 %v2998_v59, %v2997_v56  ;;  %v4604_v13 = vld [vmem:[%s6001_s11 + $0x18] sm:$0xff]  ;;  %v4603_v11 = vld [vmem:[%s6001_s11 + $0x10] sm:$0xff] }
 0x5f1   :  { %v2872_v35 = vsel %vm2093_vm9, %v2861_v8, 0.0  ;;  %3167 = vrot.lane.b32.xlu2 %v3166_v20, %s4725_s28  ;;  %3245 = vmatpush.bf16.msra.mxu2 %v4599_v5  ;;  %v4602_v8 = vld [vmem:[%s6001_s11 + $0x8] sm:$0xff]  ;;  %v3150_v16 = vpop.permute.xlu2 %3149 }
 0x5f2   :  { %v2873_v27 = vrot.slane %v2872_v35, 4  ;;  %v3000_v60 = vrot.slane %v2999_v1, 1  ;;  %3297 = vmatpush.bf16.msrb.mxu3 %v4604_v13  ;;  %v3188_v61 = vsel %vm2093_vm9, %v5894_v54, %v3150_v16  ;;  %v4624_v54 = vld [vmem:[%s6000_s10] ss:$0 sm:$0xff] }
 0x5f4   :  { %v2874_v45 = vadd.f32 %v2873_v27, %v2872_v35  ;;  %v3001_v57 = vadd.f32 %v3000_v60, %v2999_v1 }
 0x5f5   :  { %3246 = vmatpush.bf16.msra.mxu2 %v4598_v33 }
 0x5f6   :  { %v2875_v48 = vrot.slane %v2874_v45, 2  ;;  %v3009_v0 = vmul.f32 %v3001_v57, %v5889_v7  ;;  %3298 = vmatpush.bf16.msrb.mxu3 %v4603_v11 }
 0x5f8   :  { %v2876_v39 = vadd.f32 %v2875_v48, %v2874_v45  ;;  %v2863_v42 = vpop.f32.mrf.mxu1  ;;  %v3100_v52 = vpop.f32.mrf.mxu0 }
 0x5f9   :  { %v3125_v49 = vsel %vm2093_vm9, %v3100_v52, 0.0 }
 0x5fa   :  { %v2877_v58 = vrot.slane %v2876_v39, 1  ;;  %v3126_v21 = vrot.slane %v3125_v49, 4  ;;  %3299 = vmatpush.bf16.msrb.mxu3 %v4602_v8 }
 0x5fc   :  { %v2878_v40 = vadd.f32 %v2877_v58, %v2876_v39  ;;  %v3127_v26 = vadd.f32 %v3126_v21, %v3125_v49  ;;  %v4601_v58 = vld [vmem:[%s6001_s11] sm:$0xff]  ;;  %s3315_s11 = sshll.u32 %s6003_s13, 4  ;;  %s3316_s11 = int_to_ptr.hbm [resolvable:$true] %s3315_s11 }
 0x5fe   :  { %v2880_v50 = vmul.f32 %v2878_v40, %v5889_v7  ;;  %v3128_v19 = vrot.slane %v3127_v26, 2  ;;  %3300 = vmatpush.bf16.msrb.mxu3 %v4601_v58 }
 0x600   :  { %v2991_v62 = vpop.f32.mrf.mxu1  ;;  %v3102_v63 = vpop.f32.mrf.mxu0  ;;  %v3172_v53 = vsel %vm3143_vm11, %v2880_v50, %v2879_v34  ;;  %v3129_v22 = vadd.f32 %v3128_v19, %v3127_v26 }
 0x601   :  { %v3002_v9 = vsel %vm2093_vm9, %v2991_v62, 0.0  ;;  %3173 = vrot.lane.b32.xlu1 %v3172_v53, %s4723_s3  ;;  %v4625_v62 = vld [vmem:[%s6002_s12] ss:$0 sm:$0xff] }
 0x602   :  { %v3003_v2 = vrot.slane %v3002_v9, 4  ;;  %v3130_v25 = vrot.slane %v3129_v22, 1 }
 0x604   :  { %v3004_v3 = vadd.f32 %v3003_v2, %v3002_v9  ;;  %v3131_v28 = vadd.f32 %v3130_v25, %v3129_v22 }
 0x606   :  { %v3005_v32 = vrot.slane %v3004_v3, 2  ;;  %v3139_v23 = vmul.f32 %v3131_v28, %v5889_v7 }
 0x608   :  { %v3006_v4 = vadd.f32 %v3005_v32, %v3004_v3  ;;  %v2993_v6 = vpop.f32.mrf.mxu1 }
 0x60a   :  { %v3007_v10 = vrot.slane %v3006_v4, 1 }
 0x60c   :  { %v3008_v15 = vadd.f32 %v3007_v10, %v3006_v4 }
 0x60e   :  { %v3010_v30 = vmul.f32 %v3008_v15, %v5889_v7 }
 0x610   :  { %v3121_v44 = vpop.f32.mrf.mxu1  ;;  %v3178_v46 = vsel %vm3143_vm11, %v3010_v30, %v3009_v0 }
 0x611   :  { %v3132_v12 = vsel %vm2093_vm9, %v3121_v44, 0.0  ;;  %3179 = vrot.lane.b32.xlu2 %v3178_v46, %s4722_s26 }
 0x612   :  { %v3133_v37 = vrot.slane %v3132_v12, 4 }
 0x614   :  { %v3134_v41 = vadd.f32 %v3133_v37, %v3132_v12 }
 0x616   :  { %v3135_v14 = vrot.slane %v3134_v41, 2 }
 0x618   :  { %v3136_v18 = vadd.f32 %v3135_v14, %v3134_v41  ;;  %v3123_v38 = vpop.f32.mrf.mxu1  ;;  %v3156_v35 = vpop.permute.xlu0 %3155 }
 0x619   :  { %v3190_v45 = vsel %vm3189_vm12, %v3188_v61, %v3156_v35 }
 0x61a   :  { %v3137_v29 = vrot.slane %v3136_v18, 1 }
 0x61c   :  { %v3138_v51 = vadd.f32 %v3137_v29, %v3136_v18 }
 0x61e   :  { %v3140_v31 = vmul.f32 %v3138_v51, %v5889_v7  ;;  %v4597_v7 = vld [vmem:[%s5999_s9] sm:$0xff] }
 0x61f   :  { %3247 = vmatpush.bf16.msra.mxu2 %v4597_v7 }
 0x620   :  { %v3184_v24 = vsel %vm3143_vm11, %v3140_v31, %v3139_v23 }
 0x621   :  { %3185 = vrot.lane.b32.xlu1 %v3184_v24, %s4719_s23 }
 0x628   :  { %v3162_v20 = vpop.permute.xlu1 %3161 }
 0x629   :  { %v3192_v43 = vsel %vm3191_vm13, %v3190_v45, %v3162_v20 }
 0x64b   :  { %v3168_v36 = vpop.permute.xlu2 %3167 }
 0x64c   :  { %v3194_v47 = vsel %vm3193_vm14, %v3192_v43, %v3168_v36 }
 0x66b   :  { %v3180_v39 = vpop.permute.xlu2 %3179 }
 0x673   :  { %v3174_v27 = vpop.permute.xlu1 %3173 }
 0x674   :  { %v3196_v48 = vsel %vm3195_vm15, %v3194_v47, %v3174_v27 }
 0x675   :  { %v3197_v52 = vsel %vm175_vm0, %v3196_v48, %v3180_v39  ;;  %vm3306_vm0 = vcmask 58368  }
 0x693   :  { %v3186_v42 = vpop.permute.xlu1 %3185 }
 0x694   :  { %v3199_v55 = vsel %vm3198_vm1, %v3197_v52, %v3186_v42 }
 0x695   :  { %v3200_v56 = vpack.c.bf16 %v3199_v55, %v3199_v55 }
 0x697   :  { %4384 = vmatmul.msk.bf16.vlgmr.msra.gmra.mxu2 %vm2052_vm7, %v3200_v56 }
 0x71a   :  { %v3249_v40 = vpop.f32.mrf.mxu2 }
 0x71b   :  { %v3250_v59 = vadd.f32 %v4624_v54, %v3249_v40 }
 0x71d   :  { %v3253_v34 = vpack.c.bf16 %v3250_v59, %v3250_v59 }
 0x71f   :  { %4401 = vmatmul.msk.bf16.vlgmr.msrb.gmra.mxu3 %vm2052_vm7, %v3253_v34 }
 0x722   :  { %v3251_v50 = vpop.f32.mrf.mxu2 }
 0x7a2   :  { %v3302_v63 = vpop.f32.mrf.mxu3 }
 0x7a3   :  { %v3303_v53 = vadd.f32 %v4625_v62, %v3302_v63 }
 0x7a5   :  { %3307 = vst.msk [vmem:[#allocation2] sm:$0x3] %vm3306_vm0, %v3303_v53 }
 0x7a6   :  { %3318 = dma.vmem_to_hbm [thread:$0]  %s3314_s2, 32, %s3316_s11, [#allocation3]  }
 0x7aa   :  { %v3304_v9 = vpop.f32.mrf.mxu3 }
 0x7ab   :  { %4716 = dma.done.wait [#allocation3], 32  }
 0x7ac   :  { %4717 = vsyncadd [#allocation3], 4294967264 }
 0x7ad   :  { %3323 = vsyncpa [#allocation3], 1 }

</bundles_post_ra>
